<compile_context>
chip_gen: v5e
topology: v5e:2x2
jax: 0.10.0
libtpu: 0.0.40
codegen_flags: <defaults>
</compile_context>

<pallas_src>
import functools

import jax
import jax.numpy as jnp
import numpy as np
from jax.experimental import pallas as pl
from jax.experimental.pallas import tpu as pltpu

PADDING = 0.1


def _round_up(x, m):
    return ((x + m - 1) // m) * m


def _dot(a, b):
    # default precision -> native bf16 MXU pass, f32 accumulation
    return jnp.dot(a, b, preferred_element_type=jnp.float32)


def _bf16_dot(a_f32, b_bf16):
    # explicit bf16 MXU operands (matches default-precision truncation), f32 acc
    return jnp.dot(a_f32.astype(jnp.bfloat16), b_bf16,
                   preferred_element_type=jnp.float32)


# ----------------------------------------------------------------------------
# Plain-JAX glue: coordinate normalization + grid_sample (border, align_corners)
# TODO(synk): F.grid_sample is data-dependent; implemented as take_along_axis
# gathers in plain JAX (not inside the Pallas kernel).
# ----------------------------------------------------------------------------
def normalize_coordinate(p, padding=PADDING, plane='xz'):
    if plane == 'xz':
        xy = jnp.stack([p[..., 0], p[..., 2]], axis=-1)
    elif plane == 'xy':
        xy = jnp.stack([p[..., 0], p[..., 1]], axis=-1)
    else:  # 'yz'
        xy = jnp.stack([p[..., 1], p[..., 2]], axis=-1)
    xy_new = xy / (1.0 + padding + 10e-6) + 0.5
    return jnp.clip(xy_new, 0.0, 1.0 - 10e-6)


def normalize_3d_coordinate(p, padding=PADDING):
    p_nor = p / (1.0 + padding + 10e-4) + 0.5
    return jnp.clip(p_nor, 0.0, 1.0 - 10e-4)


def _gather_bct(cf, flat_idx):
    # cf: (B, C, S); flat_idx: (B, T) -> (B, C, T)
    B, C, _ = cf.shape
    idx = jnp.broadcast_to(flat_idx[:, None, :], (B, C, flat_idx.shape[-1]))
    return jnp.take_along_axis(cf, idx, axis=2)


def _grid_sample_2d(c, gx, gy):
    # c: (B, C, H, W); gx -> W axis, gy -> H axis, both in [-1, 1], shape (B, T)
    B, C, H, W = c.shape
    ix = jnp.clip((gx + 1.0) * 0.5 * (W - 1), 0.0, W - 1)
    iy = jnp.clip((gy + 1.0) * 0.5 * (H - 1), 0.0, H - 1)
    x0f, y0f = jnp.floor(ix), jnp.floor(iy)
    wx1, wy1 = ix - x0f, iy - y0f
    wx0, wy0 = 1.0 - wx1, 1.0 - wy1
    x0 = x0f.astype(jnp.int32)
    y0 = y0f.astype(jnp.int32)
    x1 = jnp.minimum(x0 + 1, W - 1)
    y1 = jnp.minimum(y0 + 1, H - 1)
    cf = c.reshape(B, C, H * W)

    def corner(yy, xx, w):
        return _gather_bct(cf, yy * W + xx) * w[:, None, :]

    return (corner(y0, x0, wy0 * wx0) + corner(y0, x1, wy0 * wx1) +
            corner(y1, x0, wy1 * wx0) + corner(y1, x1, wy1 * wx1))   # (B, C, T)


def _grid_sample_3d(c, gx, gy, gz):
    # c: (B, C, D, H, W); gx -> W, gy -> H, gz -> D, each (B, T) in [-1, 1]
    B, C, D, H, W = c.shape
    ix = jnp.clip((gx + 1.0) * 0.5 * (W - 1), 0.0, W - 1)
    iy = jnp.clip((gy + 1.0) * 0.5 * (H - 1), 0.0, H - 1)
    iz = jnp.clip((gz + 1.0) * 0.5 * (D - 1), 0.0, D - 1)
    x0f, y0f, z0f = jnp.floor(ix), jnp.floor(iy), jnp.floor(iz)
    wx1, wy1, wz1 = ix - x0f, iy - y0f, iz - z0f
    wx0, wy0, wz0 = 1.0 - wx1, 1.0 - wy1, 1.0 - wz1
    x0 = x0f.astype(jnp.int32)
    y0 = y0f.astype(jnp.int32)
    z0 = z0f.astype(jnp.int32)
    x1 = jnp.minimum(x0 + 1, W - 1)
    y1 = jnp.minimum(y0 + 1, H - 1)
    z1 = jnp.minimum(z0 + 1, D - 1)
    cf = c.reshape(B, C, D * H * W)

    out = jnp.zeros((B, C, gx.shape[-1]), jnp.float32)
    for zz, wz in ((z0, wz0), (z1, wz1)):
        for yy, wy in ((y0, wy0), (y1, wy1)):
            for xx, wx in ((x0, wx0), (x1, wx1)):
                flat = (zz * H + yy) * W + xx
                out = out + _gather_bct(cf, flat) * (wz * wy * wx)[:, None, :]
    return out                                                      # (B, C, T)


def sample_plane_feature(p, c, plane, padding=PADDING):
    xy = normalize_coordinate(p, padding=padding, plane=plane)      # (B, T, 2)
    vgrid = 2.0 * xy - 1.0
    return _grid_sample_2d(c, vgrid[..., 0], vgrid[..., 1])          # (B, C, T)


def sample_grid_feature(p, c, padding=PADDING):
    p_nor = normalize_3d_coordinate(p, padding=padding)
    vgrid = 2.0 * p_nor - 1.0
    return _grid_sample_3d(c, vgrid[..., 0], vgrid[..., 1], vgrid[..., 2])


# ----------------------------------------------------------------------------
# Pallas kernel: the decoder MLP hot path
#   net = fc_p(p)
#   for i in range(n_blocks): net = net + fc_c[i](c); net = ResnetBlockFC(net)
#   out = fc_out(relu(net))
# ----------------------------------------------------------------------------
def _decoder_kernel(n_blocks, hidden,
                    pc_ref,                 # (TM, dim + c_dim)      bf16
                    wcc_ref, bcc_ref,       # (dim+c_dim, nb*h) bf16, (1, nb*h) f32
                    w0_ref, b0_ref,         # (nb, h, h) bf16, (nb, 1, h) f32
                    w1_ref, b1_ref,         # (nb, h, h) bf16, (nb, 1, h) f32
                    wo_t_ref, bo_ref,       # (1, h) f32, (1, 1) f32
                    out_ref,                # (1, TM)  f32
                    cond_ref):              # VMEM scratch (TM, nb*h) f32
    # One fused matmul covers fc_p and all n_blocks fc_c layers; stage the result
    # in VMEM scratch so it does not occupy vregs across the whole unrolled loop.
    cond_ref[...] = (jnp.dot(pc_ref[...], wcc_ref[...],
                             preferred_element_type=jnp.float32) + bcc_ref[...])
    net = cond_ref[:, :hidden]                          # fc_p(p) + fc_c[0](c)
    for i in range(n_blocks):
        if i > 0:
            net = net + cond_ref[:, i * hidden:(i + 1) * hidden]   # + fc_c[i](c)
        # ResnetBlockFC (size_in == size_out -> identity shortcut)
        h = _bf16_dot(jnp.maximum(net, 0.0), w0_ref[i]) + b0_ref[i]
        dx = _bf16_dot(jnp.maximum(h, 0.0), w1_ref[i]) + b1_ref[i]
        net = net + dx
    # fc_out, emitted as a lane-dense (1, TM) row so stores are unmasked vst.
    # NOTE(review): if this dot_general lowers to a full (TM, hidden) transpose,
    # swap to a VPU broadcast-mul + lane-sum + narrow (TM,1)->(1,TM) transpose.
    act = jnp.maximum(net, 0.0)                         # (TM, hidden) f32
    out = jax.lax.dot_general(
        wo_t_ref[...], act,
        dimension_numbers=(((1,), (1,)), ((), ())),
        preferred_element_type=jnp.float32)             # (1, TM)
    out_ref[...] = out + bo_ref[...]


def _full_spec(arr):
    nd = arr.ndim
    return pl.BlockSpec(arr.shape, lambda i, _nd=nd: (0,) * _nd)


def pack_params(params, n_blocks):
    """Fuse fc_p and all fc_c weights into one matmul operand; bf16 the big ones."""
    wp, bp = params['wp'], params['bp']            # (dim, hidden), (1, hidden)
    wc, bc = params['wc'], params['bc']            # (nb, c_dim, hidden), (nb, 1, hidden)
    # p-rows: wp feeds only block 0's column group, zeros elsewhere
    w_p = jnp.concatenate([wp] + [jnp.zeros_like(wp)] * (n_blocks - 1), axis=1)
    w_c = jnp.concatenate([wc[i] for i in range(n_blocks)], axis=1)
    wcc = jnp.concatenate([w_p, w_c], axis=0).astype(jnp.bfloat16)
    bcc = jnp.concatenate([bp + bc[0]] + [bc[i] for i in range(1, n_blocks)],
                          axis=1)                  # (1, nb*hidden) f32
    wo_t = jnp.transpose(params['wo'])             # (1, hidden) f32 (tiny; keep f32)
    return (wcc, bcc,
            params['w0'].astype(jnp.bfloat16), params['b0'],
            params['w1'].astype(jnp.bfloat16), params['b1'],
            wo_t, params['bo'])


def decoder_mlp_pallas(pc_flat, packed, n_blocks, hidden, tile_m=1024):
    N, K = pc_flat.shape
    # Largest lane-aligned tile (<= tile_m) covering N. Do NOT shrink the tile
    # just to manufacture grid steps: v5e/v6e have a single TensorCore and bigger
    # tiles amortize per-step overhead / MXU weight latching.
    # TODO(synk): on v7x (2 TCs), prefer an even number of grid steps for tiny N.
    tm = max(128, min(tile_m, pl.cdiv(N, 128) * 128))
    n_pad = pl.cdiv(N, tm) * tm
    if n_pad != N:
        pc_flat = jnp.pad(pc_flat, ((0, n_pad - N), (0, 0)))

    in_specs = [pl.BlockSpec((tm, K), lambda i: (i, 0))]
    in_specs += [_full_spec(w) for w in packed]
    # TODO(synk): at production sizes (hidden=256, nb=5), single-buffer the
    # constant-index weight specs (pipeline_mode=pl.Buffered(1)) to halve
    # resident weight VMEM on v7x's 64 MiB budget.

    weight_bytes = sum(int(np.prod(w.shape)) * w.dtype.itemsize for w in packed)
    flops = 2 * n_pad * (K * n_blocks * hidden
                         + 2 * n_blocks * hidden * hidden + hidden)
    bytes_accessed = int(n_pad * K * pc_flat.dtype.itemsize
                         + weight_bytes + n_pad * 4)

    # Explicit VMEM budget: double-buffered pc tile + out row, cond scratch,
    # resident weights (conservatively x2), plus activation spill headroom.
    est = (2 * tm * _round_up(K, 128) * 2
           + 2 * tm * 4
           + tm * _round_up(n_blocks * hidden, 128) * 4
           + 2 * weight_bytes
           + 4 * tm * _round_up(hidden, 128) * 4)
    vmem_limit = int(min(64 << 20, max(32 << 20, 2 * est)))

    out = pl.pallas_call(
        functools.partial(_decoder_kernel, n_blocks, hidden),
        out_shape=jax.ShapeDtypeStruct((1, n_pad), jnp.float32),
        grid=(n_pad // tm,),
        in_specs=in_specs,
        out_specs=pl.BlockSpec((1, tm), lambda i: (0, i)),
        scratch_shapes=[pltpu.VMEM((tm, n_blocks * hidden), jnp.float32)],
        compiler_params=pltpu.CompilerParams(
            dimension_semantics=("parallel",),
            vmem_limit_bytes=vmem_limit),
        cost_estimate=pl.CostEstimate(flops=flops, transcendentals=0,
                                      bytes_accessed=bytes_accessed),
    )(pc_flat, *packed)
    return out[0, :N]


# ----------------------------------------------------------------------------
# Full LocalDecoder forward
# ----------------------------------------------------------------------------
def _sample_all(p, c_plane):
    feats = []
    if 'grid' in c_plane:
        feats.append(sample_grid_feature(p, c_plane['grid']))
    if 'xz' in c_plane:
        feats.append(sample_plane_feature(p, c_plane['xz'], plane='xz'))
    if 'xy' in c_plane:
        feats.append(sample_plane_feature(p, c_plane['xy'], plane='xy'))
    if 'yz' in c_plane:
        feats.append(sample_plane_feature(p, c_plane['yz'], plane='yz'))
    c = feats[0]
    for f in feats[1:]:
        c = c + f
    return jnp.transpose(c, (0, 2, 1))               # (B, T, c_dim)


def local_decoder_forward(p, c_plane, params, n_blocks):
    B, T, dim = p.shape
    c = _sample_all(p, c_plane)                      # (B, T, c_dim) f32
    hidden = params['wp'].shape[1]
    pc = jnp.concatenate(
        [p.astype(jnp.float32).reshape(B * T, dim),
         c.reshape(B * T, -1)], axis=1)              # (N, dim + c_dim)
    # Stream the only HBM-bound operand in bf16 (matches default MXU truncation).
    pc = pc.astype(jnp.bfloat16)
    packed = pack_params(params, n_blocks)
    out = decoder_mlp_pallas(pc, packed, n_blocks, hidden)
    return out.reshape(B, T)                         # == .squeeze(-1) of (B, T, 1)


def reference_forward(p, c_plane, params, n_blocks):
    c = _sample_all(p, c_plane)
    B, T, dim = p.shape
    pf = p.astype(jnp.float32).reshape(B * T, dim)
    cf = c.reshape(B * T, -1)
    net = _dot(pf, params['wp']) + params['bp']
    for i in range(n_blocks):
        net = net + _dot(cf, params['wc'][i]) + params['bc'][i]
        h = _dot(jnp.maximum(net, 0.0), params['w0'][i]) + params['b0'][i]
        dx = _dot(jnp.maximum(h, 0.0), params['w1'][i]) + params['b1'][i]
        net = net + dx
    out = _dot(jnp.maximum(net, 0.0), params['wo']) + params['bo']
    return out.reshape(B, T)


def init_params(key, dim, c_dim, hidden, n_blocks):
    # Deterministic synthetic weights. Stored pre-transposed: (in, out).
    # TODO(synk): ConvONet's ResnetBlockFC zero-inits fc_1; random init used here
    # since this is a synthetic kernel (forward semantics unchanged).
    ks = jax.random.split(key, 10)

    def w(k, shape, fan_in):
        return jax.random.normal(k, shape, jnp.float32) / jnp.sqrt(float(fan_in))

    return dict(
        wp=w(ks[0], (dim, hidden), dim),
        bp=w(ks[1], (1, hidden), hidden),
        wc=w(ks[2], (n_blocks, c_dim, hidden), c_dim),
        bc=w(ks[3], (n_blocks, 1, hidden), hidden),
        w0=w(ks[4], (n_blocks, hidden, hidden), hidden),
        b0=w(ks[5], (n_blocks, 1, hidden), hidden),
        w1=w(ks[6], (n_blocks, hidden, hidden), hidden),
        b1=w(ks[7], (n_blocks, 1, hidden), hidden),
        wo=w(ks[8], (hidden, 1), hidden),
        bo=w(ks[9], (1, 1), hidden),
    )


if __name__ == "__main__":
    B, T, dim = 2, 128, 3
    c_dim, hidden, n_blocks = 32, 64, 3
    R = 8  # plane / grid resolution

    key = jax.random.PRNGKey(0)
    ks = jax.random.split(key, 8)
    p = jax.random.uniform(ks[0], (B, T, dim), jnp.float32, -0.5, 0.5)
    c_plane = {
        'xz': jax.random.normal(ks[1], (B, c_dim, R, R), jnp.float32),
        'xy': jax.random.normal(ks[2], (B, c_dim, R, R), jnp.float32),
        'yz': jax.random.normal(ks[3], (B, c_dim, R, R), jnp.float32),
        'grid': jax.random.normal(ks[4], (B, c_dim, R, R, R), jnp.float32),
    }
    params = init_params(ks[5], dim, c_dim, hidden, n_blocks)

    out = local_decoder_forward(p, c_plane, params, n_blocks)
    out = jax.block_until_ready(out)
    assert out.shape == (B, T)

    ref = jax.block_until_ready(reference_forward(p, c_plane, params, n_blocks))
    np.testing.assert_allclose(np.asarray(out), np.asarray(ref),
                               rtol=2e-2, atol=2e-2)
    print("KERNEL_OK")
</pallas_src>

<mosaic_0001>
module attributes {stable_mosaic.version = 11 : i64} {
  func.func @_decoder_kernel(%arg0: i32, %arg1: memref<256x35xbf16, #tpu.memory_space<vmem>>, %arg2: memref<35x192xbf16, #tpu.memory_space<vmem>>, %arg3: memref<1x192xf32, #tpu.memory_space<vmem>>, %arg4: memref<3x64x64xbf16, #tpu.memory_space<vmem>>, %arg5: memref<3x1x64xf32, #tpu.memory_space<vmem>>, %arg6: memref<3x64x64xbf16, #tpu.memory_space<vmem>>, %arg7: memref<3x1x64xf32, #tpu.memory_space<vmem>>, %arg8: memref<1x64xf32, #tpu.memory_space<vmem>>, %arg9: memref<1x1xf32, #tpu.memory_space<vmem>>, %arg10: memref<1x256xf32, #tpu.memory_space<vmem>>, %arg11: memref<256x192xf32, #tpu.memory_space<vmem>>) attributes {dimension_semantics = [#tpu.dimension_semantics<parallel>], iteration_bounds = array<i64: 1>, scalar_prefetch = 0 : i64, scratch_operands = 1 : i64, tpu.core_type = #tpu.core_type<tc>, window_params = [{transform_indices = @transform_0, window_bounds = array<i64: 256, 35>}, {pipeline_mode = #tpu.pipeline_mode<synchronous>, transform_indices = @transform_1, window_bounds = array<i64: 35, 192>}, {pipeline_mode = #tpu.pipeline_mode<synchronous>, transform_indices = @transform_2, window_bounds = array<i64: 1, 192>}, {pipeline_mode = #tpu.pipeline_mode<synchronous>, transform_indices = @transform_3, window_bounds = array<i64: 3, 64, 64>}, {pipeline_mode = #tpu.pipeline_mode<synchronous>, transform_indices = @transform_4, window_bounds = array<i64: 3, 1, 64>}, {pipeline_mode = #tpu.pipeline_mode<synchronous>, transform_indices = @transform_5, window_bounds = array<i64: 3, 64, 64>}, {pipeline_mode = #tpu.pipeline_mode<synchronous>, transform_indices = @transform_6, window_bounds = array<i64: 3, 1, 64>}, {pipeline_mode = #tpu.pipeline_mode<synchronous>, transform_indices = @transform_7, window_bounds = array<i64: 1, 64>}, {pipeline_mode = #tpu.pipeline_mode<synchronous>, transform_indices = @transform_8, window_bounds = array<i64: 1, 1>}, {transform_indices = @transform_9, window_bounds = array<i64: 1, 256>}]} {
    %c0 = arith.constant 0 : index
    %c0_0 = arith.constant 0 : index
    %0 = vector.load %arg1[%c0, %c0_0] : memref<256x35xbf16, #tpu.memory_space<vmem>>, vector<256x35xbf16>
    %c0_1 = arith.constant 0 : index
    %c0_2 = arith.constant 0 : index
    %1 = vector.load %arg2[%c0_1, %c0_2] : memref<35x192xbf16, #tpu.memory_space<vmem>>, vector<35x192xbf16>
    %cst = arith.constant dense<0.000000e+00> : vector<256x192xf32>
    %2 = tpu.matmul %0, %1, %cst {dimension_numbers = #tpu.dot_dimension_numbers<[1], [0], [0], [1], [0, 0, 1, 1], [], []>} : vector<256x35xbf16>, vector<35x192xbf16>, vector<256x192xf32> -> vector<256x192xf32>
    %c0_3 = arith.constant 0 : index
    %c0_4 = arith.constant 0 : index
    %3 = vector.load %arg3[%c0_3, %c0_4] : memref<1x192xf32, #tpu.memory_space<vmem>>, vector<1x192xf32>
    %4 = vector.broadcast %3 : vector<1x192xf32> to vector<256x192xf32>
    %5 = arith.addf %2, %4 : vector<256x192xf32>
    %c0_5 = arith.constant 0 : index
    %c0_6 = arith.constant 0 : index
    %6 = vector.load %arg11[%c0_5, %c0_6] : memref<256x192xf32, #tpu.memory_space<vmem>>, vector<256x192xf32>
    tpu.vector_store %arg11[%c0_5, %c0_6], %5 {strides = array<i32>} : memref<256x192xf32, #tpu.memory_space<vmem>>, vector<256x192xf32>,
    %c0_7 = arith.constant 0 : index
    %c0_8 = arith.constant 0 : index
    %7 = vector.load %arg11[%c0_7, %c0_8] : memref<256x192xf32, #tpu.memory_space<vmem>>, vector<256x64xf32>
    %cst_9 = arith.constant 0.000000e+00 : f32
    %8 = vector.broadcast %cst_9 : f32 to vector<256x64xf32>
    %9 = arith.maximumf %7, %8 : vector<256x64xf32>
    %c0_10 = arith.constant 0 : index
    %c0_11 = arith.constant 0 : index
    %c0_12 = arith.constant 0 : index
    %10 = vector.load %arg4[%c0_10, %c0_11, %c0_12] : memref<3x64x64xbf16, #tpu.memory_space<vmem>>, vector<1x64x64xbf16>
    %11 = vector.shape_cast %10 : vector<1x64x64xbf16> to vector<64x64xbf16>
    %12 = arith.truncf %9 : vector<256x64xf32> to vector<256x64xbf16>
    %cst_13 = arith.constant dense<0.000000e+00> : vector<256x64xf32>
    %13 = tpu.matmul %12, %11, %cst_13 {dimension_numbers = #tpu.dot_dimension_numbers<[1], [0], [0], [1], [0, 0, 1, 1], [], []>} : vector<256x64xbf16>, vector<64x64xbf16>, vector<256x64xf32> -> vector<256x64xf32>
    %c0_14 = arith.constant 0 : index
    %c0_15 = arith.constant 0 : index
    %c0_16 = arith.constant 0 : index
    %14 = vector.load %arg5[%c0_14, %c0_15, %c0_16] : memref<3x1x64xf32, #tpu.memory_space<vmem>>, vector<1x1x64xf32>
    %15 = vector.shape_cast %14 : vector<1x1x64xf32> to vector<1x64xf32>
    %16 = vector.broadcast %15 : vector<1x64xf32> to vector<256x64xf32>
    %17 = arith.addf %13, %16 : vector<256x64xf32>
    %cst_17 = arith.constant 0.000000e+00 : f32
    %18 = vector.broadcast %cst_17 : f32 to vector<256x64xf32>
    %19 = arith.maximumf %17, %18 : vector<256x64xf32>
    %c0_18 = arith.constant 0 : index
    %c0_19 = arith.constant 0 : index
    %c0_20 = arith.constant 0 : index
    %20 = vector.load %arg6[%c0_18, %c0_19, %c0_20] : memref<3x64x64xbf16, #tpu.memory_space<vmem>>, vector<1x64x64xbf16>
    %21 = vector.shape_cast %20 : vector<1x64x64xbf16> to vector<64x64xbf16>
    %22 = arith.truncf %19 : vector<256x64xf32> to vector<256x64xbf16>
    %cst_21 = arith.constant dense<0.000000e+00> : vector<256x64xf32>
    %23 = tpu.matmul %22, %21, %cst_21 {dimension_numbers = #tpu.dot_dimension_numbers<[1], [0], [0], [1], [0, 0, 1, 1], [], []>} : vector<256x64xbf16>, vector<64x64xbf16>, vector<256x64xf32> -> vector<256x64xf32>
    %c0_22 = arith.constant 0 : index
    %c0_23 = arith.constant 0 : index
    %c0_24 = arith.constant 0 : index
    %24 = vector.load %arg7[%c0_22, %c0_23, %c0_24] : memref<3x1x64xf32, #tpu.memory_space<vmem>>, vector<1x1x64xf32>
    %25 = vector.shape_cast %24 : vector<1x1x64xf32> to vector<1x64xf32>
    %26 = vector.broadcast %25 : vector<1x64xf32> to vector<256x64xf32>
    %27 = arith.addf %23, %26 : vector<256x64xf32>
    %28 = arith.addf %7, %27 : vector<256x64xf32>
    %c0_25 = arith.constant 0 : index
    %c64 = arith.constant 64 : index
    %29 = vector.load %arg11[%c0_25, %c64] : memref<256x192xf32, #tpu.memory_space<vmem>>, vector<256x64xf32>
    %30 = arith.addf %28, %29 : vector<256x64xf32>
    %cst_26 = arith.constant 0.000000e+00 : f32
    %31 = vector.broadcast %cst_26 : f32 to vector<256x64xf32>
    %32 = arith.maximumf %30, %31 : vector<256x64xf32>
    %c1 = arith.constant 1 : index
    %c0_27 = arith.constant 0 : index
    %c0_28 = arith.constant 0 : index
    %33 = vector.load %arg4[%c1, %c0_27, %c0_28] : memref<3x64x64xbf16, #tpu.memory_space<vmem>>, vector<1x64x64xbf16>
    %34 = vector.shape_cast %33 : vector<1x64x64xbf16> to vector<64x64xbf16>
    %35 = arith.truncf %32 : vector<256x64xf32> to vector<256x64xbf16>
    %cst_29 = arith.constant dense<0.000000e+00> : vector<256x64xf32>
    %36 = tpu.matmul %35, %34, %cst_29 {dimension_numbers = #tpu.dot_dimension_numbers<[1], [0], [0], [1], [0, 0, 1, 1], [], []>} : vector<256x64xbf16>, vector<64x64xbf16>, vector<256x64xf32> -> vector<256x64xf32>
    %c1_30 = arith.constant 1 : index
    %c0_31 = arith.constant 0 : index
    %c0_32 = arith.constant 0 : index
    %37 = vector.load %arg5[%c1_30, %c0_31, %c0_32] : memref<3x1x64xf32, #tpu.memory_space<vmem>>, vector<1x1x64xf32>
    %38 = vector.shape_cast %37 : vector<1x1x64xf32> to vector<1x64xf32>
    %39 = vector.broadcast %38 : vector<1x64xf32> to vector<256x64xf32>
    %40 = arith.addf %36, %39 : vector<256x64xf32>
    %cst_33 = arith.constant 0.000000e+00 : f32
    %41 = vector.broadcast %cst_33 : f32 to vector<256x64xf32>
    %42 = arith.maximumf %40, %41 : vector<256x64xf32>
    %c1_34 = arith.constant 1 : index
    %c0_35 = arith.constant 0 : index
    %c0_36 = arith.constant 0 : index
    %43 = vector.load %arg6[%c1_34, %c0_35, %c0_36] : memref<3x64x64xbf16, #tpu.memory_space<vmem>>, vector<1x64x64xbf16>
    %44 = vector.shape_cast %43 : vector<1x64x64xbf16> to vector<64x64xbf16>
    %45 = arith.truncf %42 : vector<256x64xf32> to vector<256x64xbf16>
    %cst_37 = arith.constant dense<0.000000e+00> : vector<256x64xf32>
    %46 = tpu.matmul %45, %44, %cst_37 {dimension_numbers = #tpu.dot_dimension_numbers<[1], [0], [0], [1], [0, 0, 1, 1], [], []>} : vector<256x64xbf16>, vector<64x64xbf16>, vector<256x64xf32> -> vector<256x64xf32>
    %c1_38 = arith.constant 1 : index
    %c0_39 = arith.constant 0 : index
    %c0_40 = arith.constant 0 : index
    %47 = vector.load %arg7[%c1_38, %c0_39, %c0_40] : memref<3x1x64xf32, #tpu.memory_space<vmem>>, vector<1x1x64xf32>
    %48 = vector.shape_cast %47 : vector<1x1x64xf32> to vector<1x64xf32>
    %49 = vector.broadcast %48 : vector<1x64xf32> to vector<256x64xf32>
    %50 = arith.addf %46, %49 : vector<256x64xf32>
    %51 = arith.addf %30, %50 : vector<256x64xf32>
    %c0_41 = arith.constant 0 : index
    %c128 = arith.constant 128 : index
    %52 = vector.load %arg11[%c0_41, %c128] : memref<256x192xf32, #tpu.memory_space<vmem>>, vector<256x64xf32>
    %53 = arith.addf %51, %52 : vector<256x64xf32>
    %cst_42 = arith.constant 0.000000e+00 : f32
    %54 = vector.broadcast %cst_42 : f32 to vector<256x64xf32>
    %55 = arith.maximumf %53, %54 : vector<256x64xf32>
    %c2 = arith.constant 2 : index
    %c0_43 = arith.constant 0 : index
    %c0_44 = arith.constant 0 : index
    %56 = vector.load %arg4[%c2, %c0_43, %c0_44] : memref<3x64x64xbf16, #tpu.memory_space<vmem>>, vector<1x64x64xbf16>
    %57 = vector.shape_cast %56 : vector<1x64x64xbf16> to vector<64x64xbf16>
    %58 = arith.truncf %55 : vector<256x64xf32> to vector<256x64xbf16>
    %cst_45 = arith.constant dense<0.000000e+00> : vector<256x64xf32>
    %59 = tpu.matmul %58, %57, %cst_45 {dimension_numbers = #tpu.dot_dimension_numbers<[1], [0], [0], [1], [0, 0, 1, 1], [], []>} : vector<256x64xbf16>, vector<64x64xbf16>, vector<256x64xf32> -> vector<256x64xf32>
    %c2_46 = arith.constant 2 : index
    %c0_47 = arith.constant 0 : index
    %c0_48 = arith.constant 0 : index
    %60 = vector.load %arg5[%c2_46, %c0_47, %c0_48] : memref<3x1x64xf32, #tpu.memory_space<vmem>>, vector<1x1x64xf32>
    %61 = vector.shape_cast %60 : vector<1x1x64xf32> to vector<1x64xf32>
    %62 = vector.broadcast %61 : vector<1x64xf32> to vector<256x64xf32>
    %63 = arith.addf %59, %62 : vector<256x64xf32>
    %cst_49 = arith.constant 0.000000e+00 : f32
    %64 = vector.broadcast %cst_49 : f32 to vector<256x64xf32>
    %65 = arith.maximumf %63, %64 : vector<256x64xf32>
    %c2_50 = arith.constant 2 : index
    %c0_51 = arith.constant 0 : index
    %c0_52 = arith.constant 0 : index
    %66 = vector.load %arg6[%c2_50, %c0_51, %c0_52] : memref<3x64x64xbf16, #tpu.memory_space<vmem>>, vector<1x64x64xbf16>
    %67 = vector.shape_cast %66 : vector<1x64x64xbf16> to vector<64x64xbf16>
    %68 = arith.truncf %65 : vector<256x64xf32> to vector<256x64xbf16>
    %cst_53 = arith.constant dense<0.000000e+00> : vector<256x64xf32>
    %69 = tpu.matmul %68, %67, %cst_53 {dimension_numbers = #tpu.dot_dimension_numbers<[1], [0], [0], [1], [0, 0, 1, 1], [], []>} : vector<256x64xbf16>, vector<64x64xbf16>, vector<256x64xf32> -> vector<256x64xf32>
    %c2_54 = arith.constant 2 : index
    %c0_55 = arith.constant 0 : index
    %c0_56 = arith.constant 0 : index
    %70 = vector.load %arg7[%c2_54, %c0_55, %c0_56] : memref<3x1x64xf32, #tpu.memory_space<vmem>>, vector<1x1x64xf32>
    %71 = vector.shape_cast %70 : vector<1x1x64xf32> to vector<1x64xf32>
    %72 = vector.broadcast %71 : vector<1x64xf32> to vector<256x64xf32>
    %73 = arith.addf %69, %72 : vector<256x64xf32>
    %74 = arith.addf %53, %73 : vector<256x64xf32>
    %cst_57 = arith.constant 0.000000e+00 : f32
    %75 = vector.broadcast %cst_57 : f32 to vector<256x64xf32>
    %76 = arith.maximumf %74, %75 : vector<256x64xf32>
    %c0_58 = arith.constant 0 : index
    %c0_59 = arith.constant 0 : index
    %77 = vector.load %arg8[%c0_58, %c0_59] : memref<1x64xf32, #tpu.memory_space<vmem>>, vector<1x64xf32>
    %cst_60 = arith.constant dense<0.000000e+00> : vector<1x256xf32>
    %78 = tpu.matmul %77, %76, %cst_60 {dimension_numbers = #tpu.dot_dimension_numbers<[1], [1], [0], [0], [0, 0, 1, 0], [], []>} : vector<1x64xf32>, vector<256x64xf32>, vector<1x256xf32> -> vector<1x256xf32>
    %c0_61 = arith.constant 0 : index
    %c0_62 = arith.constant 0 : index
    %79 = vector.load %arg9[%c0_61, %c0_62] : memref<1x1xf32, #tpu.memory_space<vmem>>, vector<1x1xf32>
    %80 = vector.broadcast %79 : vector<1x1xf32> to vector<1x256xf32>
    %81 = arith.addf %78, %80 : vector<1x256xf32>
    %c0_63 = arith.constant 0 : index
    %c0_64 = arith.constant 0 : index
    %82 = vector.load %arg10[%c0_63, %c0_64] : memref<1x256xf32, #tpu.memory_space<vmem>>, vector<1x256xf32>
    tpu.vector_store %arg10[%c0_63, %c0_64], %81 {strides = array<i32>} : memref<1x256xf32, #tpu.memory_space<vmem>>, vector<1x256xf32>,
    return
  }
  func.func @transform_0(%arg0: i32) -> (i32, i32) {
    %c0_i32 = arith.constant 0 : i32
    %c0_i32_0 = arith.constant 0 : i32
    return %arg0, %c0_i32 : i32, i32
  }
  func.func @transform_1(%arg0: i32) -> (i32, i32) {
    %c0_i32 = arith.constant 0 : i32
    %c0_i32_0 = arith.constant 0 : i32
    %c0_i32_1 = arith.constant 0 : i32
    return %c0_i32, %c0_i32_0 : i32, i32
  }
  func.func @transform_2(%arg0: i32) -> (i32, i32) {
    %c0_i32 = arith.constant 0 : i32
    %c0_i32_0 = arith.constant 0 : i32
    %c0_i32_1 = arith.constant 0 : i32
    return %c0_i32, %c0_i32_0 : i32, i32
  }
  func.func @transform_3(%arg0: i32) -> (i32, i32, i32) {
    %c0_i32 = arith.constant 0 : i32
    %c0_i32_0 = arith.constant 0 : i32
    %c0_i32_1 = arith.constant 0 : i32
    %c0_i32_2 = arith.constant 0 : i32
    return %c0_i32, %c0_i32_0, %c0_i32_1 : i32, i32, i32
  }
  func.func @transform_4(%arg0: i32) -> (i32, i32, i32) {
    %c0_i32 = arith.constant 0 : i32
    %c0_i32_0 = arith.constant 0 : i32
    %c0_i32_1 = arith.constant 0 : i32
    %c0_i32_2 = arith.constant 0 : i32
    return %c0_i32, %c0_i32_0, %c0_i32_1 : i32, i32, i32
  }
  func.func @transform_5(%arg0: i32) -> (i32, i32, i32) {
    %c0_i32 = arith.constant 0 : i32
    %c0_i32_0 = arith.constant 0 : i32
    %c0_i32_1 = arith.constant 0 : i32
    %c0_i32_2 = arith.constant 0 : i32
    return %c0_i32, %c0_i32_0, %c0_i32_1 : i32, i32, i32
  }
  func.func @transform_6(%arg0: i32) -> (i32, i32, i32) {
    %c0_i32 = arith.constant 0 : i32
    %c0_i32_0 = arith.constant 0 : i32
    %c0_i32_1 = arith.constant 0 : i32
    %c0_i32_2 = arith.constant 0 : i32
    return %c0_i32, %c0_i32_0, %c0_i32_1 : i32, i32, i32
  }
  func.func @transform_7(%arg0: i32) -> (i32, i32) {
    %c0_i32 = arith.constant 0 : i32
    %c0_i32_0 = arith.constant 0 : i32
    %c0_i32_1 = arith.constant 0 : i32
    return %c0_i32, %c0_i32_0 : i32, i32
  }
  func.func @transform_8(%arg0: i32) -> (i32, i32) {
    %c0_i32 = arith.constant 0 : i32
    %c0_i32_0 = arith.constant 0 : i32
    %c0_i32_1 = arith.constant 0 : i32
    return %c0_i32, %c0_i32_0 : i32, i32
  }
  func.func @transform_9(%arg0: i32) -> (i32, i32) {
    %c0_i32 = arith.constant 0 : i32
    %c0_i32_0 = arith.constant 0 : i32
    return %c0_i32, %arg0 : i32, i32
  }
}

</mosaic_0001>

<bundles_post_ra>
// kernel: tpu_custom_call.1
= control target key start
LH: loop header
LB: loop body
LE: loop exit
PB: predicated region body
PF: predicated region fallthrough
CT: control target
= control target key end

     0   :  { %s4098_s0 = inlined_call_operand.vmem [shape: bf16[256,35], index: 0, kind: input, shape index: {}]   ;;  %s4099_s1 = inlined_call_operand.vmem [shape: bf16[35,192], index: 1, kind: input, shape index: {}]   ;;  %s4100_s2 = inlined_call_operand.vmem [shape: f32[1,192], index: 2, kind: input, shape index: {}]   ;;  %s4101_s3 = inlined_call_operand.vmem [shape: bf16[3,64,64], index: 3, kind: input, shape index: {}]   ;;  %s4102_s4 = inlined_call_operand.vmem [shape: f32[3,1,64], index: 4, kind: input, shape index: {}]   ;;  %s4103_s5 = inlined_call_operand.hbm [shape: bf16[3,64,64], index: 5, kind: input, shape index: {}]   ;;  %s4104_s6 = inlined_call_operand.vmem [shape: f32[3,1,64], index: 6, kind: input, shape index: {}]   ;;  %s4105_s7 = inlined_call_operand.vmem [shape: f32[1,64], index: 7, kind: input, shape index: {}]   ;;  %s4106_s8 = inlined_call_operand.<no memory space> [shape: f32[1,1], index: 8, kind: input, shape index: {}]   ;;  %s4107_s9 = inlined_call_operand.hbm [shape: f32[1,256], index: 9, kind: output, shape index: {}]  }
   0x1   :  { %v14_v0 = vstv %s4106_s8 }
   0x2   :  { %15 = vst [vmem:[#allocation3] sm:$0x1] %v14_v0 }
   0x3   :  { %16 = vsyncpa [#allocation5], 0 }
   0x4   :  { %17 = vsyncpa [#allocation6], 0  ;;  %s32_s13 = sshll.u32 %s4103_s5, 4  ;;  %s2862_s14 = smov [#allocation4]   ;;  %s33_s13 = int_to_ptr.hbm [resolvable:$true] %s32_s13 }
   0x5   :  { %s34_s15 = sshll.u32 %s2862_s14, 4  ;;  %s2863_s16 = smov 64   ;;  %s35_s15 = int_to_ptr.vmem [resolvable:$true] %s34_s15 }
   0x6   :  { %s2864_s17 = smov 4  }
   0x7   :  { %40 = dma.hbm_to_vmem [thread:$0]  %s33_s13, 1536, %s35_s15, [#allocation5], %s2863_s16, %s2863_s16, %s2864_s17  }
   0x8   :  { %2858 = dma.done.wait [#allocation5], 1536  }
   0x9   :  { %2859 = vsyncadd [#allocation5], 4294965760  ;;  %vm249_vm0 = vcmask 1040384   ;;  %vm250_vm1 = vcmask 1041408   ;;  %v2865_v1 = vmov 65535   ;;  %v2951_v14 = vld [vmem:[%s4098_s0] sm:$0xff] }
   0xa   :  { %v251_v2 = vsel %vm249_vm0, 4294967295, %v2865_v1  ;;  %v2930_v3 = vld [vmem:[%s4099_s1 + $0x20] sm:$0x33]  ;;  %v2468_v6 = vld [vmem:[%s4099_s1 + $0x10] sm:$0xf]  ;;  %vm200_vm2 = vcmask 285696  }
   0xb   :  { %v188_v4 = vunpack.c.l.b16 %v2930_v3  ;;  %v2933_v5 = vsel %vm250_vm1, %v251_v2, 0  ;;  %v2771_v8 = vld [vmem:[%s4099_s1 + $0x14] sm:$0xf0]  ;;  %v2460_v11 = vld [vmem:[%s4099_s1] sm:$0xf]  ;;  %v2958_v15 = vld [vmem:[%s4098_s0 + $0x8] sm:$0xff] }
   0xc   :  { %v2469_v10 = vor.u32 %v2771_v8, %v2468_v6  ;;  %v2769_v12 = vld [vmem:[%s4099_s1 + $0x4] sm:$0xf0]  ;;  %v2965_v16 = vld [vmem:[%s4098_s0 + $0x10] sm:$0xff]  ;;  %v2972_v17 = vld [vmem:[%s4098_s0 + $0x18] sm:$0xff]  ;;  %vm438_vm3 = vcmask 523264   ;;  %s2384_s11 = sshll.u32 %s4107_s9, 4  ;;  %s2385_s11 = int_to_ptr.hbm [resolvable:$true] %s2384_s11 }
   0xd   :  { %v194_v7 = vpack.c.b16 %v188_v4, %v188_v4  ;;  %v2461_v13 = vor.u32 %v2769_v12, %v2460_v11  ;;  %v2979_v18 = vld [vmem:[%s4098_s0 + $0x20] sm:$0xff]  ;;  %v2986_v19 = vld [vmem:[%s4098_s0 + $0x28] sm:$0xff]  ;;  %v2775_v20 = vld [vmem:[%s4101_s3 + $0x18] sm:$0xff] }
   0xe   :  { %v2996_v21 = vld [vmem:[%s4098_s0 + $0x30] sm:$0xff]  ;;  %670 = vmatpush.bf16.msra.mxu2 %v2775_v20  ;;  %v2773_v23 = vld [vmem:[%s4101_s3 + $0x8] sm:$0xff]  ;;  %v2772_v24 = vld [vmem:[%s4101_s3] sm:$0xff] }
   0xf   :  { %v254_v9 = vand.u32 %v2933_v5, %v194_v7  ;;  %v2774_v22 = vld [vmem:[%s4101_s3 + $0x10] sm:$0xff]  ;;  %v3012_v25 = vld [vmem:[%s4098_s0 + $0x38] sm:$0xff]  ;;  %v3019_v26 = vld [vmem:[%s4100_s2] sm:$0x3] }
  0x10   :  { %v3022_v27 = vperm.slane %v3019_v26, 0  ;;  %v3027_v28 = vld [vmem:[%s4098_s0 + $0x40] sm:$0xff]  ;;  %v3046_v36 = vld [vmem:[%s4098_s0 + $0x48] sm:$0xff]  ;;  %v3066_v44 = vld [vmem:[%s4098_s0 + $0x50] sm:$0xff] }
  0x11   :  { %264 = vmatpush.bf16.msra.mxu0 %v254_v9  ;;  %v3086_v52 = vld [vmem:[%s4098_s0 + $0x58] sm:$0xff]  ;;  %v3106_v60 = vld [vmem:[%s4098_s0 + $0x60] sm:$0xff]  ;;  %v3126_v6 = vld [vmem:[%s4098_s0 + $0x68] sm:$0xff] }
  0x12   :  { %671 = vmatpush.bf16.msra.mxu2 %v2774_v22  ;;  %v3146_v20 = vld [vmem:[%s4098_s0 + $0x70] sm:$0xff] }
  0x15   :  { %265 = vmatpush.bf16.msra.mxu0 %v2469_v10 }
  0x16   :  { %672 = vmatpush.bf16.msra.mxu2 %v2773_v23 }
  0x19   :  { %266 = vmatpush.bf16.msra.mxu0 %v2461_v13 }
  0x1a   :  { %673 = vmatpush.bf16.msra.mxu2 %v2772_v24 }
  0x1c   :  { %2474 = vmatmul.msk.bf16.vlgmr.msra.gmra.mxu0 %vm200_vm2, %v2951_v14 }
  0x2c   :  { %2475 = vmatmul.msk.bf16.gmra.mxu0 %vm200_vm2, %v2958_v15 }
  0x3c   :  { %2476 = vmatmul.msk.bf16.gmra.mxu0 %vm200_vm2, %v2965_v16 }
  0x4c   :  { %2477 = vmatmul.msk.bf16.gmra.mxu0 %vm200_vm2, %v2972_v17 }
  0x5c   :  { %2478 = vmatmul.msk.bf16.gmra.mxu0 %vm200_vm2, %v2979_v18 }
  0x6c   :  { %2479 = vmatmul.msk.bf16.gmra.mxu0 %vm200_vm2, %v2986_v19 }
  0x7c   :  { %2480 = vmatmul.msk.bf16.gmra.mxu0 %vm200_vm2, %v2996_v21 }
  0x8c   :  { %2481 = vmatmul.msk.bf16.gmra.mxu0 %vm200_vm2, %v3012_v25 }
  0x99   :  { %v268_v29 = vpop.f32.mrf.mxu0 }
  0x9a   :  { %v3030_v30 = vadd.f32 %v268_v29, %v3022_v27 }
  0x9c   :  { %2482 = vmatmul.msk.bf16.gmra.mxu0 %vm200_vm2, %v3027_v28  ;;  %1040 = vrot.lane.b32.xlu0 %v3030_v30, %s2863_s16  ;;  %v534_v33 = vmax.f32 %v3030_v30, 0.0 }
  0xa1   :  { %v270_v31 = vpop.f32.mrf.mxu0 }
  0xa2   :  { %v3037_v32 = vadd.f32 %v270_v31, %v3022_v27 }
  0xa4   :  { %v535_v34 = vmax.f32 %v3037_v32, 0.0  ;;  %1042 = vrot.lane.b32.xlu0 %v3037_v32, %s2863_s16 }
  0xa6   :  { %v574_v35 = vpack.c.bf16 %v535_v34, %v534_v33 }
  0xa8   :  { %2522 = vmatmul.msk.bf16.vlgmr.msra.gmra.mxu2 %vm438_vm3, %v574_v35  ;;  %v3166_v35 = vld [vmem:[%s4098_s0 + $0x78] sm:$0xff] }
  0xa9   :  { %v273_v37 = vpop.f32.mrf.mxu0 }
  0xaa   :  { %v3050_v38 = vadd.f32 %v273_v37, %v3022_v27 }
  0xac   :  { %2483 = vmatmul.msk.bf16.gmra.mxu0 %vm200_vm2, %v3046_v36  ;;  %1044 = vrot.lane.b32.xlu1 %v3050_v38, %s2863_s16  ;;  %v536_v41 = vmax.f32 %v3050_v38, 0.0 }
  0xb1   :  { %v275_v39 = vpop.f32.mrf.mxu0 }
  0xb2   :  { %v3057_v40 = vadd.f32 %v275_v39, %v3022_v27  ;;  %v2779_v39 = vld [vmem:[#allocation4 + $0x18] sm:$0xff] }
  0xb3   :  { %891 = vmatpush.bf16.msra.mxu3 %v2779_v39 }
  0xb4   :  { %v537_v42 = vmax.f32 %v3057_v40, 0.0  ;;  %1046 = vrot.lane.b32.xlu1 %v3057_v40, %s2863_s16 }
  0xb6   :  { %v575_v43 = vpack.c.bf16 %v537_v42, %v536_v41  ;;  %v2778_v42 = vld [vmem:[#allocation4 + $0x10] sm:$0xff] }
  0xb7   :  { %892 = vmatpush.bf16.msra.mxu3 %v2778_v42 }
  0xb8   :  { %2523 = vmatmul.msk.bf16.gmra.mxu2 %vm438_vm3, %v575_v43 }
  0xb9   :  { %v278_v45 = vpop.f32.mrf.mxu0 }
  0xba   :  { %v3070_v46 = vadd.f32 %v278_v45, %v3022_v27  ;;  %v2777_v45 = vld [vmem:[#allocation4 + $0x8] sm:$0xff] }
  0xbb   :  { %893 = vmatpush.bf16.msra.mxu3 %v2777_v45 }
  0xbc   :  { %2484 = vmatmul.msk.bf16.gmra.mxu0 %vm200_vm2, %v3066_v44  ;;  %1048 = vrot.lane.b32.xlu2 %v3070_v46, %s2863_s16  ;;  %v538_v49 = vmax.f32 %v3070_v46, 0.0 }
  0xc1   :  { %v280_v47 = vpop.f32.mrf.mxu0 }
  0xc2   :  { %v3077_v48 = vadd.f32 %v280_v47, %v3022_v27 }
  0xc4   :  { %v539_v50 = vmax.f32 %v3077_v48, 0.0  ;;  %1050 = vrot.lane.b32.xlu2 %v3077_v48, %s2863_s16 }
  0xc6   :  { %v576_v51 = vpack.c.bf16 %v539_v50, %v538_v49 }
  0xc8   :  { %2524 = vmatmul.msk.bf16.gmra.mxu2 %vm438_vm3, %v576_v51  ;;  %v2776_v51 = vld [vmem:[#allocation4] sm:$0xff] }
  0xc9   :  { %v283_v53 = vpop.f32.mrf.mxu0  ;;  %894 = vmatpush.bf16.msra.mxu3 %v2776_v51 }
  0xca   :  { %v3090_v54 = vadd.f32 %v283_v53, %v3022_v27 }
  0xcc   :  { %2485 = vmatmul.msk.bf16.gmra.mxu0 %vm200_vm2, %v3086_v52  ;;  %1052 = vrot.lane.b32.xlu0 %v3090_v54, %s2863_s16  ;;  %v540_v57 = vmax.f32 %v3090_v54, 0.0 }
  0xd1   :  { %v285_v55 = vpop.f32.mrf.mxu0 }
  0xd2   :  { %v3097_v56 = vadd.f32 %v285_v55, %v3022_v27 }
  0xd4   :  { %v541_v58 = vmax.f32 %v3097_v56, 0.0  ;;  %1054 = vrot.lane.b32.xlu1 %v3097_v56, %s2863_s16 }
  0xd6   :  { %v577_v59 = vpack.c.bf16 %v541_v58, %v540_v57 }
  0xd8   :  { %2525 = vmatmul.msk.bf16.gmra.mxu2 %vm438_vm3, %v577_v59 }
  0xd9   :  { %v288_v61 = vpop.f32.mrf.mxu0 }
  0xda   :  { %v3110_v62 = vadd.f32 %v288_v61, %v3022_v27  ;;  %v189_v61 = vunpack.c.h.b16 %v2930_v3  ;;  %v2770_v3 = vld [vmem:[%s4099_s1 + $0x14] sm:$0xf] }
  0xdc   :  { %2486 = vmatmul.msk.bf16.gmra.mxu0 %vm200_vm2, %v3106_v60  ;;  %1056 = vrot.lane.b32.xlu2 %v3110_v62, %s2863_s16  ;;  %v542_v1 = vmax.f32 %v3110_v62, 0.0 }
  0xe1   :  { %v290_v63 = vpop.f32.mrf.mxu0 }
  0xe2   :  { %v3117_v0 = vadd.f32 %v290_v63, %v3022_v27 }
  0xe4   :  { %v543_v2 = vmax.f32 %v3117_v0, 0.0  ;;  %1058 = vrot.lane.b32.xlu0 %v3117_v0, %s2863_s16 }
  0xe6   :  { %v578_v4 = vpack.c.bf16 %v543_v2, %v542_v1  ;;  %v195_v2 = vpack.c.b16 %v189_v61, %v189_v61 }
  0xe8   :  { %2526 = vmatmul.msk.bf16.gmra.mxu2 %vm438_vm3, %v578_v4 }
  0xe9   :  { %v293_v7 = vpop.f32.mrf.mxu0 }
  0xea   :  { %v3130_v8 = vadd.f32 %v293_v7, %v3022_v27  ;;  %v257_v7 = vand.u32 %v2933_v5, %v195_v2  ;;  %v3213_v5 = vld [vmem:[%s4102_s4] ss:$0 sm:$0xff] }
  0xec   :  { %2487 = vmatmul.msk.bf16.gmra.mxu0 %vm200_vm2, %v3126_v6  ;;  %1060 = vrot.lane.b32.xlu1 %v3130_v8, %s2863_s16  ;;  %v544_v11 = vmax.f32 %v3130_v8, 0.0 }
  0xed   :  { %353 = vmatpush.bf16.msra.mxu1 %v257_v7 }
  0xf1   :  { %v295_v9 = vpop.f32.mrf.mxu0 }
  0xf2   :  { %v3137_v10 = vadd.f32 %v295_v9, %v3022_v27 }
  0xf4   :  { %v545_v12 = vmax.f32 %v3137_v10, 0.0  ;;  %1062 = vrot.lane.b32.xlu2 %v3137_v10, %s2863_s16 }
  0xf6   :  { %v579_v13 = vpack.c.bf16 %v545_v12, %v544_v11  ;;  %v2470_v12 = vld [vmem:[%s4099_s1 + $0x18] sm:$0xf0] }
  0xf8   :  { %2527 = vmatmul.msk.bf16.gmra.mxu2 %vm438_vm3, %v579_v13 }
  0xf9   :  { %v298_v22 = vpop.f32.mrf.mxu0 }
  0xfa   :  { %v3150_v23 = vadd.f32 %v298_v22, %v3022_v27  ;;  %v2473_v22 = vor.u32 %v2770_v3, %v2470_v12 }
  0xfc   :  { %2488 = vmatmul.msk.bf16.gmra.mxu0 %vm200_vm2, %v3146_v20  ;;  %1064 = vrot.lane.b32.xlu0 %v3150_v23, %s2863_s16  ;;  %v546_v31 = vmax.f32 %v3150_v23, 0.0 }
  0xfd   :  { %354 = vmatpush.bf16.msra.mxu1 %v2473_v22 }
 0x101   :  { %v300_v24 = vpop.f32.mrf.mxu0 }
 0x102   :  { %v3157_v29 = vadd.f32 %v300_v24, %v3022_v27  ;;  %v2768_v24 = vld [vmem:[%s4099_s1 + $0x4] sm:$0xf] }
 0x104   :  { %v547_v33 = vmax.f32 %v3157_v29, 0.0  ;;  %1066 = vrot.lane.b32.xlu1 %v3157_v29, %s2863_s16 }
 0x106   :  { %v580_v34 = vpack.c.bf16 %v547_v33, %v546_v31  ;;  %v2462_v31 = vld [vmem:[%s4099_s1 + $0x8] sm:$0xf0] }
 0x107   :  { %v2465_v33 = vor.u32 %v2768_v24, %v2462_v31 }
 0x108   :  { %2528 = vmatmul.msk.bf16.gmra.mxu2 %vm438_vm3, %v580_v34 }
 0x109   :  { %v303_v37 = vpop.f32.mrf.mxu0  ;;  %355 = vmatpush.bf16.msra.mxu1 %v2465_v33 }
 0x10a   :  { %v3170_v41 = vadd.f32 %v303_v37, %v3022_v27 }
 0x10c   :  { %2489 = vmatmul.msk.bf16.gmra.mxu0 %vm200_vm2, %v3166_v35  ;;  %1068 = vrot.lane.b32.xlu2 %v3170_v41, %s2863_s16  ;;  %v548_v49 = vmax.f32 %v3170_v41, 0.0 }
 0x10d   :  { %2490 = vmatmul.msk.bf16.vlgmr.msra.gmra.mxu1 %vm200_vm2, %v2951_v14 }
 0x111   :  { %v305_v43 = vpop.f32.mrf.mxu0 }
 0x112   :  { %v3177_v47 = vadd.f32 %v305_v43, %v3022_v27 }
 0x114   :  { %v549_v50 = vmax.f32 %v3177_v47, 0.0  ;;  %1070 = vrot.lane.b32.xlu0 %v3177_v47, %s2863_s16 }
 0x116   :  { %v581_v53 = vpack.c.bf16 %v549_v50, %v548_v49 }
 0x118   :  { %2529 = vmatmul.msk.bf16.gmra.mxu2 %vm438_vm3, %v581_v53 }
 0x119   :  { %v308_v55 = vpop.f32.mrf.mxu0 }
 0x11a   :  { %v3185_v57 = vadd.f32 %v308_v55, %v3022_v27 }
 0x11c   :  { %1072 = vrot.lane.b32.xlu1 %v3185_v57, %s2863_s16  ;;  %v550_v63 = vmax.f32 %v3185_v57, 0.0 }
 0x11d   :  { %2491 = vmatmul.msk.bf16.gmra.mxu1 %vm200_vm2, %v2958_v15 }
 0x121   :  { %v310_v58 = vpop.f32.mrf.mxu0 }
 0x122   :  { %v3190_v59 = vadd.f32 %v310_v58, %v3022_v27 }
 0x124   :  { %v551_v1 = vmax.f32 %v3190_v59, 0.0  ;;  %1074 = vrot.lane.b32.xlu2 %v3190_v59, %s2863_s16 }
 0x126   :  { %v582_v4 = vpack.c.bf16 %v551_v1, %v550_v63 }
 0x128   :  { %2530 = vmatmul.msk.bf16.gmra.mxu2 %vm438_vm3, %v582_v4 }
 0x129   :  { %v313_v9 = vpop.f32.mrf.mxu0 }
 0x12a   :  { %v3200_v11 = vadd.f32 %v313_v9, %v3022_v27 }
 0x12b   :  { %v675_v13 = vpop.f32.mrf.mxu2 }
 0x12c   :  { %1076 = vrot.lane.b32.xlu0 %v3200_v11, %s2863_s16  ;;  %v676_v39 = vadd.f32 %v3213_v5, %v675_v13  ;;  %v552_v43 = vmax.f32 %v3200_v11, 0.0 }
 0x12d   :  { %2492 = vmatmul.msk.bf16.gmra.mxu1 %vm200_vm2, %v2965_v16 }
 0x12e   :  { %v755_v50 = vmax.f32 %v676_v39, 0.0 }
 0x131   :  { %v315_v34 = vpop.f32.mrf.mxu0 }
 0x132   :  { %v3222_v37 = vadd.f32 %v315_v34, %v3022_v27 }
 0x133   :  { %v677_v42 = vpop.f32.mrf.mxu2 }
 0x134   :  { %v678_v45 = vadd.f32 %v3213_v5, %v677_v42  ;;  %v553_v49 = vmax.f32 %v3222_v37, 0.0  ;;  %1078 = vrot.lane.b32.xlu1 %v3222_v37, %s2863_s16 }
 0x136   :  { %v756_v51 = vmax.f32 %v678_v45, 0.0  ;;  %v583_v53 = vpack.c.bf16 %v553_v49, %v552_v43 }
 0x138   :  { %2531 = vmatmul.msk.bf16.gmra.mxu2 %vm438_vm3, %v583_v53  ;;  %v795_v55 = vpack.c.bf16 %v756_v51, %v755_v50 }
 0x139   :  { %v318_v58 = vpop.f32.mrf.mxu0 }
 0x13a   :  { %v3234_v61 = vadd.f32 %v318_v58, %v3022_v27  ;;  %2554 = vmatmul.msk.bf16.vlgmr.msra.gmra.mxu3 %vm438_vm3, %v795_v55 }
 0x13b   :  { %v680_v63 = vpop.f32.mrf.mxu2 }
 0x13c   :  { %1080 = vrot.lane.b32.xlu2 %v3234_v61, %s2863_s16  ;;  %v681_v14 = vadd.f32 %v3213_v5, %v680_v63  ;;  %v554_v7 = vmax.f32 %v3234_v61, 0.0 }
 0x13d   :  { %2493 = vmatmul.msk.bf16.gmra.mxu1 %vm200_vm2, %v2972_v17 }
 0x13e   :  { %v757_v12 = vmax.f32 %v681_v14, 0.0 }
 0x141   :  { %v320_v1 = vpop.f32.mrf.mxu0 }
 0x142   :  { %v3240_v2 = vadd.f32 %v320_v1, %v3022_v27 }
 0x143   :  { %v682_v4 = vpop.f32.mrf.mxu2 }
 0x144   :  { %v683_v9 = vadd.f32 %v3213_v5, %v682_v4  ;;  %v555_v3 = vmax.f32 %v3240_v2, 0.0  ;;  %1082 = vrot.lane.b32.xlu0 %v3240_v2, %s2863_s16 }
 0x146   :  { %v758_v13 = vmax.f32 %v683_v9, 0.0  ;;  %v584_v22 = vpack.c.bf16 %v555_v3, %v554_v7 }
 0x148   :  { %2532 = vmatmul.msk.bf16.gmra.mxu2 %vm438_vm3, %v584_v22  ;;  %v796_v24 = vpack.c.bf16 %v758_v13, %v757_v12 }
 0x149   :  { %v323_v31 = vpop.f32.mrf.mxu0 }
 0x14a   :  { %v3252_v33 = vadd.f32 %v323_v31, %v3022_v27  ;;  %2555 = vmatmul.msk.bf16.gmra.mxu3 %vm438_vm3, %v796_v24 }
 0x14b   :  { %v685_v34 = vpop.f32.mrf.mxu2 }
 0x14c   :  { %1084 = vrot.lane.b32.xlu1 %v3252_v33, %s2863_s16  ;;  %v686_v15 = vadd.f32 %v3213_v5, %v685_v34  ;;  %v556_v45 = vmax.f32 %v3252_v33, 0.0 }
 0x14d   :  { %2494 = vmatmul.msk.bf16.gmra.mxu1 %vm200_vm2, %v2979_v18 }
 0x14e   :  { %v759_v51 = vmax.f32 %v686_v15, 0.0 }
 0x151   :  { %v325_v39 = vpop.f32.mrf.mxu0 }
 0x152   :  { %v3258_v42 = vadd.f32 %v325_v39, %v3022_v27 }
 0x153   :  { %v687_v43 = vpop.f32.mrf.mxu2 }
 0x154   :  { %v688_v49 = vadd.f32 %v3213_v5, %v687_v43  ;;  %v557_v50 = vmax.f32 %v3258_v42, 0.0  ;;  %1086 = vrot.lane.b32.xlu2 %v3258_v42, %s2863_s16 }
 0x156   :  { %v760_v53 = vmax.f32 %v688_v49, 0.0  ;;  %v585_v55 = vpack.c.bf16 %v557_v50, %v556_v45 }
 0x158   :  { %2533 = vmatmul.msk.bf16.gmra.mxu2 %vm438_vm3, %v585_v55  ;;  %v797_v58 = vpack.c.bf16 %v760_v53, %v759_v51 }
 0x159   :  { %v328_v63 = vpop.f32.mrf.mxu0 }
 0x15a   :  { %v3270_v1 = vadd.f32 %v328_v63, %v3022_v27  ;;  %2556 = vmatmul.msk.bf16.gmra.mxu3 %vm438_vm3, %v797_v58  ;;  %v2783_v58 = vld [vmem:[%s4101_s3 + $0x38] sm:$0xff] }
 0x15b   :  { %v690_v14 = vpop.f32.mrf.mxu2  ;;  %1306 = vmatpush.bf16.msrb.mxu0 %v2783_v58 }
 0x15c   :  { %1088 = vrot.lane.b32.xlu0 %v3270_v1, %s2863_s16  ;;  %v691_v16 = vadd.f32 %v3213_v5, %v690_v14  ;;  %v558_v3 = vmax.f32 %v3270_v1, 0.0 }
 0x15d   :  { %2495 = vmatmul.msk.bf16.gmra.mxu1 %vm200_vm2, %v2986_v19 }
 0x15e   :  { %v761_v22 = vmax.f32 %v691_v16, 0.0 }
 0x161   :  { %v330_v4 = vpop.f32.mrf.mxu0 }
 0x162   :  { %v3276_v7 = vadd.f32 %v330_v4, %v3022_v27 }
 0x163   :  { %v692_v9 = vpop.f32.mrf.mxu2 }
 0x164   :  { %v693_v12 = vadd.f32 %v3213_v5, %v692_v9  ;;  %v559_v13 = vmax.f32 %v3276_v7, 0.0  ;;  %1090 = vrot.lane.b32.xlu1 %v3276_v7, %s2863_s16 }
 0x166   :  { %v762_v24 = vmax.f32 %v693_v12, 0.0  ;;  %v586_v31 = vpack.c.bf16 %v559_v13, %v558_v3 }
 0x168   :  { %2534 = vmatmul.msk.bf16.gmra.mxu2 %vm438_vm3, %v586_v31  ;;  %v798_v34 = vpack.c.bf16 %v762_v24, %v761_v22 }
 0x169   :  { %v333_v39 = vpop.f32.mrf.mxu0 }
 0x16a   :  { %v3288_v15 = vadd.f32 %v333_v39, %v3022_v27  ;;  %2557 = vmatmul.msk.bf16.gmra.mxu3 %vm438_vm3, %v798_v34 }
 0x16b   :  { %v695_v43 = vpop.f32.mrf.mxu2 }
 0x16c   :  { %1092 = vrot.lane.b32.xlu2 %v3288_v15, %s2863_s16  ;;  %v696_v17 = vadd.f32 %v3213_v5, %v695_v43  ;;  %v560_v51 = vmax.f32 %v3288_v15, 0.0 }
 0x16d   :  { %2496 = vmatmul.msk.bf16.gmra.mxu1 %vm200_vm2, %v2996_v21 }
 0x16e   :  { %v763_v63 = vmax.f32 %v696_v17, 0.0 }
 0x171   :  { %v335_v45 = vpop.f32.mrf.mxu0 }
 0x172   :  { %v3294_v49 = vadd.f32 %v335_v45, %v3022_v27 }
 0x173   :  { %v697_v50 = vpop.f32.mrf.mxu2 }
 0x174   :  { %v698_v53 = vadd.f32 %v3213_v5, %v697_v50  ;;  %v561_v55 = vmax.f32 %v3294_v49, 0.0  ;;  %1094 = vrot.lane.b32.xlu0 %v3294_v49, %s2863_s16 }
 0x176   :  { %v764_v14 = vmax.f32 %v698_v53, 0.0  ;;  %v587_v4 = vpack.c.bf16 %v561_v55, %v560_v51 }
 0x178   :  { %2535 = vmatmul.msk.bf16.gmra.mxu2 %vm438_vm3, %v587_v4  ;;  %v799_v16 = vpack.c.bf16 %v764_v14, %v763_v63 }
 0x179   :  { %v338_v9 = vpop.f32.mrf.mxu0 }
 0x17a   :  { %v3309_v3 = vadd.f32 %v338_v9, %v3022_v27  ;;  %2558 = vmatmul.msk.bf16.gmra.mxu3 %vm438_vm3, %v799_v16 }
 0x17b   :  { %v700_v12 = vpop.f32.mrf.mxu2 }
 0x17c   :  { %1096 = vrot.lane.b32.xlu1 %v3309_v3, %s2863_s16  ;;  %v701_v22 = vadd.f32 %v3213_v5, %v700_v12  ;;  %v562_v31 = vmax.f32 %v3309_v3, 0.0 }
 0x17d   :  { %2497 = vmatmul.msk.bf16.gmra.mxu1 %vm200_vm2, %v3012_v25 }
 0x17e   :  { %v765_v43 = vmax.f32 %v701_v22, 0.0 }
 0x181   :  { %v340_v13 = vpop.f32.mrf.mxu0 }
 0x182   :  { %v3315_v18 = vadd.f32 %v340_v13, %v3022_v27 }
 0x183   :  { %v702_v24 = vpop.f32.mrf.mxu2 }
 0x184   :  { %v703_v34 = vadd.f32 %v3213_v5, %v702_v24  ;;  %v563_v39 = vmax.f32 %v3315_v18, 0.0  ;;  %1098 = vrot.lane.b32.xlu2 %v3315_v18, %s2863_s16 }
 0x186   :  { %v766_v45 = vmax.f32 %v703_v34, 0.0  ;;  %v588_v17 = vpack.c.bf16 %v563_v39, %v562_v31  ;;  %v2782_v39 = vld [vmem:[%s4101_s3 + $0x30] sm:$0xff] }
 0x187   :  { %1307 = vmatpush.bf16.msrb.mxu0 %v2782_v39 }
 0x188   :  { %2536 = vmatmul.msk.bf16.gmra.mxu2 %vm438_vm3, %v588_v17  ;;  %v800_v50 = vpack.c.bf16 %v766_v45, %v765_v43  ;;  %v2781_v17 = vld [vmem:[%s4101_s3 + $0x28] sm:$0xff] }
 0x189   :  { %v343_v51 = vpop.f32.mrf.mxu0 }
 0x18a   :  { %v3327_v53 = vadd.f32 %v343_v51, %v3022_v27  ;;  %2559 = vmatmul.msk.bf16.gmra.mxu3 %vm438_vm3, %v800_v50 }
 0x18b   :  { %v705_v55 = vpop.f32.mrf.mxu2  ;;  %1308 = vmatpush.bf16.msrb.mxu0 %v2781_v17 }
 0x18c   :  { %1100 = vrot.lane.b32.xlu0 %v3327_v53, %s2863_s16  ;;  %v706_v19 = vadd.f32 %v3213_v5, %v705_v55  ;;  %v564_v4 = vmax.f32 %v3327_v53, 0.0  ;;  %v2780_v55 = vld [vmem:[%s4101_s3 + $0x20] sm:$0xff] }
 0x18d   :  { %2498 = vmatmul.msk.bf16.gmra.mxu1 %vm200_vm2, %v3027_v28 }
 0x18e   :  { %v767_v12 = vmax.f32 %v706_v19, 0.0 }
 0x18f   :  { %1309 = vmatpush.bf16.msrb.mxu0 %v2780_v55 }
 0x191   :  { %v345_v58 = vpop.f32.mrf.mxu0 }
 0x192   :  { %v3333_v63 = vadd.f32 %v345_v58, %v3022_v27  ;;  %v357_v58 = vpop.f32.mrf.mxu1 }
 0x193   :  { %v707_v14 = vpop.f32.mrf.mxu2 }
 0x194   :  { %v708_v16 = vadd.f32 %v3213_v5, %v707_v14  ;;  %v565_v9 = vmax.f32 %v3333_v63, 0.0  ;;  %1102 = vrot.lane.b32.xlu1 %v3333_v63, %s2863_s16 }
 0x196   :  { %v768_v13 = vmax.f32 %v708_v16, 0.0  ;;  %v589_v22 = vpack.c.bf16 %v565_v9, %v564_v4  ;;  %v3362_v4 = vperm.slane %v3019_v26, 1  ;;  %v3373_v26 = vld [vmem:[%s4104_s6] ss:$0 sm:$0xff] }
 0x198   :  { %2537 = vmatmul.msk.bf16.gmra.mxu2 %vm438_vm3, %v589_v22  ;;  %v801_v27 = vpack.c.bf16 %v768_v13, %v767_v12  ;;  %v358_v12 = vadd.f32 %v357_v58, %v3362_v4 }
 0x19a   :  { %2560 = vmatmul.msk.bf16.gmra.mxu3 %vm438_vm3, %v801_v27  ;;  %439 = vst.msk [vmem:[#allocation2 + $0x8] sm:$0xff] %vm438_vm3, %v358_v12  ;;  %v359_v22 = vpop.f32.mrf.mxu1 }
 0x19b   :  { %v710_v24 = vpop.f32.mrf.mxu2  ;;  %v360_v27 = vadd.f32 %v359_v22, %v3362_v4 }
 0x19c   :  { %v711_v31 = vadd.f32 %v3213_v5, %v710_v24 }
 0x19d   :  { %441 = vst.msk [vmem:[#allocation2 + $0x18] sm:$0xff] %vm438_vm3, %v360_v27  ;;  %2499 = vmatmul.msk.bf16.gmra.mxu1 %vm200_vm2, %v3046_v36 }
 0x19e   :  { %v769_v21 = vmax.f32 %v711_v31, 0.0  ;;  %v1041_v31 = vpop.permute.xlu0 %1040 }
 0x1a2   :  { %v362_v39 = vpop.f32.mrf.mxu1 }
 0x1a3   :  { %v712_v34 = vpop.f32.mrf.mxu2 }
 0x1a4   :  { %v713_v43 = vadd.f32 %v3213_v5, %v712_v34 }
 0x1a6   :  { %v770_v45 = vmax.f32 %v713_v43, 0.0 }
 0x1a8   :  { %v802_v50 = vpack.c.bf16 %v770_v45, %v769_v21 }
 0x1aa   :  { %2561 = vmatmul.msk.bf16.gmra.mxu3 %vm438_vm3, %v802_v50  ;;  %v363_v50 = vadd.f32 %v362_v39, %v3362_v4 }
 0x1ab   :  { %v715_v51 = vpop.f32.mrf.mxu2 }
 0x1ac   :  { %v716_v25 = vadd.f32 %v3213_v5, %v715_v51  ;;  %443 = vst.msk [vmem:[#allocation2 + $0x28] sm:$0xff] %vm438_vm3, %v363_v50 }
 0x1ad   :  { %2500 = vmatmul.msk.bf16.gmra.mxu1 %vm200_vm2, %v3066_v44 }
 0x1ae   :  { %v771_v16 = vmax.f32 %v716_v25, 0.0 }
 0x1b3   :  { %v717_v19 = vpop.f32.mrf.mxu2 }
 0x1b4   :  { %v718_v14 = vadd.f32 %v3213_v5, %v717_v19 }
 0x1b6   :  { %v772_v9 = vmax.f32 %v718_v14, 0.0 }
 0x1b8   :  { %v803_v13 = vpack.c.bf16 %v772_v9, %v771_v16  ;;  %v364_v9 = vpop.f32.mrf.mxu1 }
 0x1b9   :  { %v365_v36 = vadd.f32 %v364_v9, %v3362_v4 }
 0x1ba   :  { %2562 = vmatmul.msk.bf16.gmra.mxu3 %vm438_vm3, %v803_v13 }
 0x1bb   :  { %v720_v24 = vpop.f32.mrf.mxu2  ;;  %445 = vst.msk [vmem:[#allocation2 + $0x38] sm:$0xff] %vm438_vm3, %v365_v36 }
 0x1bc   :  { %v721_v43 = vadd.f32 %v3213_v5, %v720_v24 }
 0x1bd   :  { %v896_v28 = vpop.f32.mrf.mxu3  ;;  %2501 = vmatmul.msk.bf16.gmra.mxu1 %vm200_vm2, %v3086_v52 }
 0x1be   :  { %v897_v34 = vadd.f32 %v3373_v26, %v896_v28  ;;  %v773_v55 = vmax.f32 %v721_v43, 0.0 }
 0x1c0   :  { %v976_v45 = vadd.f32 %v897_v34, %v3030_v30  ;;  %v1043_v30 = vpop.permute.xlu0 %1042  ;;  %v367_v34 = vpop.f32.mrf.mxu1 }
 0x1c2   :  { %v3385_v19 = vadd.f32 %v1041_v31, %v976_v45  ;;  %v1045_v31 = vpop.permute.xlu1 %1044 }
 0x1c3   :  { %v722_v21 = vpop.f32.mrf.mxu2 }
 0x1c4   :  { %v723_v17 = vadd.f32 %v3213_v5, %v722_v21  ;;  %v1168_v22 = vmax.f32 %v3385_v19, 0.0 }
 0x1c5   :  { %v898_v51 = vpop.f32.mrf.mxu3 }
 0x1c6   :  { %v774_v58 = vmax.f32 %v723_v17, 0.0  ;;  %v899_v25 = vadd.f32 %v3373_v26, %v898_v51  ;;  %v368_v17 = vadd.f32 %v367_v34, %v3362_v4 }
 0x1c8   :  { %v977_v14 = vadd.f32 %v899_v25, %v3037_v32  ;;  %v804_v16 = vpack.c.bf16 %v774_v58, %v773_v55  ;;  %447 = vst.msk [vmem:[#allocation2 + $0x48] sm:$0xff] %vm438_vm3, %v368_v17 }
 0x1ca   :  { %v3388_v12 = vadd.f32 %v1043_v30, %v977_v14  ;;  %2563 = vmatmul.msk.bf16.gmra.mxu3 %vm438_vm3, %v804_v16  ;;  %v369_v30 = vpop.f32.mrf.mxu1 }
 0x1cb   :  { %v725_v13 = vpop.f32.mrf.mxu2  ;;  %v370_v44 = vadd.f32 %v369_v30, %v3362_v4 }
 0x1cc   :  { %v1169_v27 = vmax.f32 %v3388_v12, 0.0  ;;  %v726_v39 = vadd.f32 %v3213_v5, %v725_v13 }
 0x1cd   :  { %v901_v24 = vpop.f32.mrf.mxu3  ;;  %449 = vst.msk [vmem:[#allocation2 + $0x58] sm:$0xff] %vm438_vm3, %v370_v44  ;;  %2502 = vmatmul.msk.bf16.gmra.mxu1 %vm200_vm2, %v3106_v60 }
 0x1ce   :  { %v1209_v28 = vpack.c.bf16 %v1169_v27, %v1168_v22  ;;  %v902_v32 = vadd.f32 %v3373_v26, %v901_v24  ;;  %v775_v51 = vmax.f32 %v726_v39, 0.0 }
 0x1d0   :  { %2595 = vmatmul.msk.bf16.vlgmr.msrb.gmra.mxu0 %vm438_vm3, %v1209_v28  ;;  %v978_v21 = vadd.f32 %v902_v32, %v3050_v38  ;;  %v1047_v38 = vpop.permute.xlu1 %1046  ;;  %v1049_v28 = vpop.permute.xlu2 %1048 }
 0x1d2   :  { %v3405_v25 = vadd.f32 %v1045_v31, %v978_v21  ;;  %v372_v31 = vpop.f32.mrf.mxu1 }
 0x1d3   :  { %v727_v43 = vpop.f32.mrf.mxu2  ;;  %v373_v21 = vadd.f32 %v372_v31, %v3362_v4 }
 0x1d4   :  { %v728_v45 = vadd.f32 %v3213_v5, %v727_v43  ;;  %v1170_v13 = vmax.f32 %v3405_v25, 0.0 }
 0x1d5   :  { %v903_v50 = vpop.f32.mrf.mxu3  ;;  %451 = vst.msk [vmem:[#allocation2 + $0x68] sm:$0xff] %vm438_vm3, %v373_v21 }
 0x1d6   :  { %v776_v55 = vmax.f32 %v728_v45, 0.0  ;;  %v904_v58 = vadd.f32 %v3373_v26, %v903_v50 }
 0x1d8   :  { %v979_v14 = vadd.f32 %v904_v58, %v3057_v40  ;;  %v805_v16 = vpack.c.bf16 %v776_v55, %v775_v51 }
 0x1da   :  { %v3408_v9 = vadd.f32 %v1047_v38, %v979_v14  ;;  %2564 = vmatmul.msk.bf16.gmra.mxu3 %vm438_vm3, %v805_v16  ;;  %v374_v16 = vpop.f32.mrf.mxu1 }
 0x1db   :  { %v730_v36 = vpop.f32.mrf.mxu2  ;;  %v375_v52 = vadd.f32 %v374_v16, %v3362_v4 }
 0x1dc   :  { %v1171_v22 = vmax.f32 %v3408_v9, 0.0  ;;  %v731_v32 = vadd.f32 %v3213_v5, %v730_v36 }
 0x1dd   :  { %v906_v27 = vpop.f32.mrf.mxu3  ;;  %453 = vst.msk [vmem:[#allocation2 + $0x78] sm:$0xff] %vm438_vm3, %v375_v52  ;;  %2503 = vmatmul.msk.bf16.gmra.mxu1 %vm200_vm2, %v3126_v6 }
 0x1de   :  { %v1210_v24 = vpack.c.bf16 %v1171_v22, %v1170_v13  ;;  %v907_v40 = vadd.f32 %v3373_v26, %v906_v27  ;;  %v777_v17 = vmax.f32 %v731_v32, 0.0 }
 0x1e0   :  { %2596 = vmatmul.msk.bf16.gmra.mxu0 %vm438_vm3, %v1210_v24  ;;  %v980_v39 = vadd.f32 %v907_v40, %v3070_v46  ;;  %v1051_v46 = vpop.permute.xlu2 %1050 }
 0x1e2   :  { %v3425_v55 = vadd.f32 %v1049_v28, %v980_v39  ;;  %v377_v27 = vpop.f32.mrf.mxu1 }
 0x1e3   :  { %v732_v34 = vpop.f32.mrf.mxu2  ;;  %v378_v32 = vadd.f32 %v377_v27, %v3362_v4 }
 0x1e4   :  { %v733_v43 = vadd.f32 %v3213_v5, %v732_v34  ;;  %v1172_v44 = vmax.f32 %v3425_v55, 0.0 }
 0x1e5   :  { %v908_v45 = vpop.f32.mrf.mxu3  ;;  %455 = vst.msk [vmem:[#allocation2 + $0x88] sm:$0xff] %vm438_vm3, %v378_v32 }
 0x1e6   :  { %v778_v50 = vmax.f32 %v733_v43, 0.0  ;;  %v909_v51 = vadd.f32 %v3373_v26, %v908_v45  ;;  %v1053_v45 = vpop.permute.xlu0 %1052 }
 0x1e8   :  { %v981_v58 = vadd.f32 %v909_v51, %v3077_v48  ;;  %v806_v14 = vpack.c.bf16 %v778_v50, %v777_v17  ;;  %v1055_v51 = vpop.permute.xlu1 %1054 }
 0x1ea   :  { %v3428_v38 = vadd.f32 %v1051_v46, %v981_v58  ;;  %2565 = vmatmul.msk.bf16.gmra.mxu3 %vm438_vm3, %v806_v14  ;;  %v379_v58 = vpop.f32.mrf.mxu1 }
 0x1eb   :  { %v735_v30 = vpop.f32.mrf.mxu2  ;;  %v380_v60 = vadd.f32 %v379_v58, %v3362_v4 }
 0x1ec   :  { %v1173_v36 = vmax.f32 %v3428_v38, 0.0  ;;  %v736_v24 = vadd.f32 %v3213_v5, %v735_v30 }
 0x1ed   :  { %v911_v13 = vpop.f32.mrf.mxu3  ;;  %457 = vst.msk [vmem:[#allocation2 + $0x98] sm:$0xff] %vm438_vm3, %v380_v60  ;;  %2504 = vmatmul.msk.bf16.gmra.mxu1 %vm200_vm2, %v3146_v20 }
 0x1ee   :  { %v1211_v22 = vpack.c.bf16 %v1173_v36, %v1172_v44  ;;  %v912_v48 = vadd.f32 %v3373_v26, %v911_v13  ;;  %v779_v39 = vmax.f32 %v736_v24, 0.0  ;;  %v2787_v24 = vld [vmem:[#allocation4 + $0x38] sm:$0xff] }
 0x1ef   :  { %1529 = vmatpush.bf16.msrb.mxu1 %v2787_v24 }
 0x1f0   :  { %2597 = vmatmul.msk.bf16.gmra.mxu0 %vm438_vm3, %v1211_v22  ;;  %v982_v40 = vadd.f32 %v912_v48, %v3090_v54 }
 0x1f2   :  { %v3445_v17 = vadd.f32 %v1053_v45, %v982_v40  ;;  %v1059_v45 = vpop.permute.xlu0 %1058 }
 0x1f3   :  { %v737_v28 = vpop.f32.mrf.mxu2 }
 0x1f4   :  { %v738_v31 = vadd.f32 %v3213_v5, %v737_v28  ;;  %v1174_v16 = vmax.f32 %v3445_v17, 0.0 }
 0x1f5   :  { %v913_v34 = vpop.f32.mrf.mxu3 }
 0x1f6   :  { %v780_v43 = vmax.f32 %v738_v31, 0.0  ;;  %v914_v21 = vadd.f32 %v3373_v26, %v913_v34 }
 0x1f8   :  { %v807_v50 = vpack.c.bf16 %v780_v43, %v779_v39  ;;  %v983_v54 = vadd.f32 %v914_v21, %v3097_v56  ;;  %v382_v56 = vpop.f32.mrf.mxu1  ;;  %v1057_v39 = vpop.permute.xlu2 %1056 }
 0x1f9   :  { %v383_v28 = vadd.f32 %v382_v56, %v3362_v4 }
 0x1fa   :  { %v3448_v14 = vadd.f32 %v1055_v51, %v983_v54  ;;  %2566 = vmatmul.msk.bf16.gmra.mxu3 %vm438_vm3, %v807_v50 }
 0x1fb   :  { %v740_v46 = vpop.f32.mrf.mxu2  ;;  %459 = vst.msk [vmem:[#allocation2 + $0xa8] sm:$0xff] %vm438_vm3, %v383_v28  ;;  %v1061_v28 = vpop.permute.xlu1 %1060 }
 0x1fc   :  { %v1175_v52 = vmax.f32 %v3448_v14, 0.0  ;;  %v741_v13 = vadd.f32 %v3213_v5, %v740_v46 }
 0x1fd   :  { %v916_v30 = vpop.f32.mrf.mxu3  ;;  %2505 = vmatmul.msk.bf16.gmra.mxu1 %vm200_vm2, %v3166_v35 }
 0x1fe   :  { %v1212_v44 = vpack.c.bf16 %v1175_v52, %v1174_v16  ;;  %v917_v36 = vadd.f32 %v3373_v26, %v916_v30  ;;  %v781_v31 = vmax.f32 %v741_v13, 0.0 }
 0x200   :  { %2598 = vmatmul.msk.bf16.gmra.mxu0 %vm438_vm3, %v1212_v44  ;;  %v984_v48 = vadd.f32 %v917_v36, %v3110_v62  ;;  %v384_v50 = vpop.f32.mrf.mxu1 }
 0x201   :  { %v385_v6 = vadd.f32 %v384_v50, %v3362_v4 }
 0x202   :  { %v3465_v43 = vadd.f32 %v1057_v39, %v984_v48 }
 0x203   :  { %v742_v22 = vpop.f32.mrf.mxu2  ;;  %461 = vst.msk [vmem:[#allocation2 + $0xb8] sm:$0xff] %vm438_vm3, %v385_v6 }
 0x204   :  { %v743_v27 = vadd.f32 %v3213_v5, %v742_v22  ;;  %v1176_v58 = vmax.f32 %v3465_v43, 0.0 }
 0x205   :  { %v918_v40 = vpop.f32.mrf.mxu3 }
 0x206   :  { %v782_v32 = vmax.f32 %v743_v27, 0.0  ;;  %v919_v34 = vadd.f32 %v3373_v26, %v918_v40 }
 0x208   :  { %v808_v62 = vpack.c.bf16 %v782_v32, %v781_v31  ;;  %v985_v21 = vadd.f32 %v919_v34, %v3117_v0  ;;  %v387_v0 = vpop.f32.mrf.mxu1  ;;  %v1063_v32 = vpop.permute.xlu2 %1062 }
 0x209   :  { %v388_v13 = vadd.f32 %v387_v0, %v3362_v4 }
 0x20a   :  { %v3468_v54 = vadd.f32 %v1059_v45, %v985_v21  ;;  %2567 = vmatmul.msk.bf16.gmra.mxu3 %vm438_vm3, %v808_v62 }
 0x20b   :  { %v745_v51 = vpop.f32.mrf.mxu2  ;;  %463 = vst.msk [vmem:[#allocation2 + $0xc8] sm:$0xff] %vm438_vm3, %v388_v13 }
 0x20c   :  { %v1177_v60 = vmax.f32 %v3468_v54, 0.0  ;;  %v746_v30 = vadd.f32 %v3213_v5, %v745_v51 }
 0x20d   :  { %v921_v46 = vpop.f32.mrf.mxu3 }
 0x20e   :  { %v1213_v16 = vpack.c.bf16 %v1177_v60, %v1176_v58  ;;  %v922_v52 = vadd.f32 %v3373_v26, %v921_v46  ;;  %v783_v48 = vmax.f32 %v746_v30, 0.0 }
 0x210   :  { %2599 = vmatmul.msk.bf16.gmra.mxu0 %vm438_vm3, %v1213_v16  ;;  %v986_v36 = vadd.f32 %v922_v52, %v3130_v8  ;;  %v389_v34 = vpop.f32.mrf.mxu1 }
 0x211   :  { %v390_v20 = vadd.f32 %v389_v34, %v3362_v4 }
 0x212   :  { %v3485_v40 = vadd.f32 %v1061_v28, %v986_v36 }
 0x213   :  { %v747_v44 = vpop.f32.mrf.mxu2  ;;  %465 = vst.msk [vmem:[#allocation2 + $0xd8] sm:$0xff] %vm438_vm3, %v390_v20  ;;  %v2785_v20 = vld [vmem:[#allocation4 + $0x28] sm:$0xff] }
 0x214   :  { %v748_v56 = vadd.f32 %v3213_v5, %v747_v44  ;;  %v1178_v21 = vmax.f32 %v3485_v40, 0.0 }
 0x215   :  { %v923_v22 = vpop.f32.mrf.mxu3 }
 0x216   :  { %v784_v27 = vmax.f32 %v748_v56, 0.0  ;;  %v924_v24 = vadd.f32 %v3373_v26, %v923_v22  ;;  %v1065_v56 = vpop.permute.xlu0 %1064 }
 0x218   :  { %v809_v31 = vpack.c.bf16 %v784_v27, %v783_v48  ;;  %v987_v8 = vadd.f32 %v924_v24, %v3137_v10  ;;  %v392_v10 = vpop.f32.mrf.mxu1  ;;  %v1067_v48 = vpop.permute.xlu1 %1066 }
 0x219   :  { %v393_v52 = vadd.f32 %v392_v10, %v3362_v4 }
 0x21a   :  { %v3488_v39 = vadd.f32 %v1063_v32, %v987_v8  ;;  %2568 = vmatmul.msk.bf16.gmra.mxu3 %vm438_vm3, %v809_v31  ;;  %v2786_v32 = vld [vmem:[#allocation4 + $0x30] sm:$0xff] }
 0x21b   :  { %v750_v62 = vpop.f32.mrf.mxu2  ;;  %467 = vst.msk [vmem:[#allocation2 + $0xe8] sm:$0xff] %vm438_vm3, %v393_v52  ;;  %1530 = vmatpush.bf16.msrb.mxu1 %v2786_v32 }
 0x21c   :  { %v1179_v45 = vmax.f32 %v3488_v39, 0.0  ;;  %v751_v58 = vadd.f32 %v3213_v5, %v750_v62 }
 0x21d   :  { %v926_v50 = vpop.f32.mrf.mxu3 }
 0x21e   :  { %v1214_v6 = vpack.c.bf16 %v1179_v45, %v1178_v21  ;;  %v927_v51 = vadd.f32 %v3373_v26, %v926_v50  ;;  %v785_v30 = vmax.f32 %v751_v58, 0.0 }
 0x21f   :  { %1531 = vmatpush.bf16.msrb.mxu1 %v2785_v20 }
 0x220   :  { %2600 = vmatmul.msk.bf16.gmra.mxu0 %vm438_vm3, %v1214_v6  ;;  %v988_v46 = vadd.f32 %v927_v51, %v3150_v23  ;;  %v1069_v6 = vpop.permute.xlu2 %1068  ;;  %v2784_v51 = vld [vmem:[#allocation4 + $0x20] sm:$0xff] }
 0x222   :  { %v3505_v13 = vadd.f32 %v1065_v56, %v988_v46 }
 0x223   :  { %v752_v60 = vpop.f32.mrf.mxu2  ;;  %1532 = vmatpush.bf16.msrb.mxu1 %v2784_v51 }
 0x224   :  { %v753_v16 = vadd.f32 %v3213_v5, %v752_v60  ;;  %v394_v5 = vpop.f32.mrf.mxu1  ;;  %v1180_v24 = vmax.f32 %v3505_v13, 0.0  ;;  %v1071_v60 = vpop.permute.xlu0 %1070 }
 0x225   :  { %v928_v0 = vpop.f32.mrf.mxu3  ;;  %v395_v35 = vadd.f32 %v394_v5, %v3362_v4  ;;  %v1073_v5 = vpop.permute.xlu1 %1072 }
 0x226   :  { %v786_v44 = vmax.f32 %v753_v16, 0.0  ;;  %v929_v36 = vadd.f32 %v3373_v26, %v928_v0 }
 0x227   :  { %469 = vst.msk [vmem:[#allocation2 + $0xf8] sm:$0xff] %vm438_vm3, %v395_v35 }
 0x228   :  { %v810_v22 = vpack.c.bf16 %v786_v44, %v785_v30  ;;  %v989_v23 = vadd.f32 %v929_v36, %v3157_v29 }
 0x22a   :  { %v3508_v27 = vadd.f32 %v1067_v48, %v989_v23  ;;  %2569 = vmatmul.msk.bf16.gmra.mxu3 %vm438_vm3, %v810_v22 }
 0x22c   :  { %v1181_v28 = vmax.f32 %v3508_v27, 0.0  ;;  %v397_v29 = vpop.f32.mrf.mxu1 }
 0x22d   :  { %v931_v31 = vpop.f32.mrf.mxu3  ;;  %v398_v21 = vadd.f32 %v397_v29, %v3362_v4 }
 0x22e   :  { %v1215_v8 = vpack.c.bf16 %v1181_v28, %v1180_v24  ;;  %v932_v34 = vadd.f32 %v3373_v26, %v931_v31  ;;  %v1075_v28 = vpop.permute.xlu2 %1074 }
 0x22f   :  { %471 = vst.msk [vmem:[#allocation2 + $0x108] sm:$0xff] %vm438_vm3, %v398_v21 }
 0x230   :  { %2601 = vmatmul.msk.bf16.gmra.mxu0 %vm438_vm3, %v1215_v8  ;;  %v990_v62 = vadd.f32 %v932_v34, %v3170_v41 }
 0x232   :  { %v3521_v10 = vadd.f32 %v1069_v6, %v990_v62 }
 0x234   :  { %v399_v46 = vpop.f32.mrf.mxu1  ;;  %v1182_v52 = vmax.f32 %v3521_v10, 0.0 }
 0x235   :  { %v933_v45 = vpop.f32.mrf.mxu3  ;;  %v400_v41 = vadd.f32 %v399_v46, %v3362_v4 }
 0x236   :  { %v934_v50 = vadd.f32 %v3373_v26, %v933_v45 }
 0x237   :  { %473 = vst.msk [vmem:[#allocation2 + $0x118] sm:$0xff] %vm438_vm3, %v400_v41 }
 0x238   :  { %v991_v58 = vadd.f32 %v934_v50, %v3177_v47 }
 0x23a   :  { %v3524_v16 = vadd.f32 %v1071_v60, %v991_v58 }
 0x23c   :  { %v1183_v0 = vmax.f32 %v3524_v16, 0.0  ;;  %v402_v47 = vpop.f32.mrf.mxu1 }
 0x23d   :  { %v936_v30 = vpop.f32.mrf.mxu3  ;;  %v403_v22 = vadd.f32 %v402_v47, %v3362_v4 }
 0x23e   :  { %v1216_v44 = vpack.c.bf16 %v1183_v0, %v1182_v52  ;;  %v937_v36 = vadd.f32 %v3373_v26, %v936_v30  ;;  %v1077_v52 = vpop.permute.xlu0 %1076 }
 0x23f   :  { %475 = vst.msk [vmem:[#allocation2 + $0x128] sm:$0xff] %vm438_vm3, %v403_v22 }
 0x240   :  { %2602 = vmatmul.msk.bf16.gmra.mxu0 %vm438_vm3, %v1216_v44  ;;  %v992_v56 = vadd.f32 %v937_v36, %v3185_v57 }
 0x242   :  { %v3536_v35 = vadd.f32 %v1073_v5, %v992_v56 }
 0x244   :  { %v404_v31 = vpop.f32.mrf.mxu1  ;;  %v1184_v57 = vmax.f32 %v3536_v35, 0.0 }
 0x245   :  { %v938_v23 = vpop.f32.mrf.mxu3  ;;  %v405_v32 = vadd.f32 %v404_v31, %v3362_v4 }
 0x246   :  { %v939_v48 = vadd.f32 %v3373_v26, %v938_v23 }
 0x247   :  { %477 = vst.msk [vmem:[#allocation2 + $0x138] sm:$0xff] %vm438_vm3, %v405_v32 }
 0x248   :  { %v993_v24 = vadd.f32 %v939_v48, %v3190_v59  ;;  %v3549_v59 = vld [vmem:[%s4102_s4 + $0x1] ss:$0 sm:$0xff] }
 0x24a   :  { %v3539_v8 = vadd.f32 %v1075_v28, %v993_v24 }
 0x24c   :  { %v1185_v34 = vmax.f32 %v3539_v8, 0.0  ;;  %v407_v45 = vpop.f32.mrf.mxu1 }
 0x24d   :  { %v941_v29 = vpop.f32.mrf.mxu3  ;;  %v1311_v20 = vpop.f32.mrf.mxu0  ;;  %v408_v51 = vadd.f32 %v407_v45, %v3362_v4 }
 0x24e   :  { %v1217_v62 = vpack.c.bf16 %v1185_v34, %v1184_v57  ;;  %v942_v21 = vadd.f32 %v3373_v26, %v941_v29  ;;  %v1312_v6 = vadd.f32 %v3549_v59, %v1311_v20 }
 0x24f   :  { %479 = vst.msk [vmem:[#allocation2 + $0x148] sm:$0xff] %vm438_vm3, %v408_v51 }
 0x250   :  { %2603 = vmatmul.msk.bf16.gmra.mxu0 %vm438_vm3, %v1217_v62  ;;  %v994_v50 = vadd.f32 %v942_v21, %v3200_v11  ;;  %v1391_v30 = vmax.f32 %v1312_v6, 0.0  ;;  %v1079_v11 = vpop.permute.xlu1 %1078 }
 0x252   :  { %v3558_v0 = vadd.f32 %v1077_v52, %v994_v50  ;;  %v1081_v50 = vpop.permute.xlu2 %1080 }
 0x254   :  { %v409_v47 = vpop.f32.mrf.mxu1  ;;  %v1186_v48 = vmax.f32 %v3558_v0, 0.0 }
 0x255   :  { %v943_v58 = vpop.f32.mrf.mxu3  ;;  %v1313_v60 = vpop.f32.mrf.mxu0  ;;  %v410_v23 = vadd.f32 %v409_v47, %v3362_v4 }
 0x256   :  { %v944_v46 = vadd.f32 %v3373_v26, %v943_v58  ;;  %v1314_v41 = vadd.f32 %v3549_v59, %v1313_v60 }
 0x257   :  { %481 = vst.msk [vmem:[#allocation2 + $0x158] sm:$0xff] %vm438_vm3, %v410_v23 }
 0x258   :  { %v995_v44 = vadd.f32 %v944_v46, %v3222_v37  ;;  %v1392_v36 = vmax.f32 %v1314_v41, 0.0 }
 0x25a   :  { %v3561_v56 = vadd.f32 %v1079_v11, %v995_v44  ;;  %v1432_v22 = vpack.c.bf16 %v1392_v36, %v1391_v30 }
 0x25c   :  { %v1187_v5 = vmax.f32 %v3561_v56, 0.0  ;;  %2628 = vmatmul.msk.bf16.vlgmr.msrb.gmra.mxu1 %vm438_vm3, %v1432_v22  ;;  %v412_v32 = vpop.f32.mrf.mxu1 }
 0x25d   :  { %v946_v24 = vpop.f32.mrf.mxu3  ;;  %v1316_v28 = vpop.f32.mrf.mxu0  ;;  %v413_v29 = vadd.f32 %v412_v32, %v3362_v4 }
 0x25e   :  { %v1218_v31 = vpack.c.bf16 %v1187_v5, %v1186_v48  ;;  %v947_v37 = vadd.f32 %v3373_v26, %v946_v24  ;;  %v1317_v34 = vadd.f32 %v3549_v59, %v1316_v28 }
 0x25f   :  { %483 = vst.msk [vmem:[#allocation2 + $0x168] sm:$0xff] %vm438_vm3, %v413_v29 }
 0x260   :  { %2604 = vmatmul.msk.bf16.gmra.mxu0 %vm438_vm3, %v1218_v31  ;;  %v996_v57 = vadd.f32 %v947_v37, %v3234_v61  ;;  %v1393_v51 = vmax.f32 %v1317_v34, 0.0  ;;  %v1083_v61 = vpop.permute.xlu0 %1082 }
 0x262   :  { %v3576_v6 = vadd.f32 %v1081_v50, %v996_v57  ;;  %v1085_v57 = vpop.permute.xlu1 %1084 }
 0x264   :  { %v414_v46 = vpop.f32.mrf.mxu1  ;;  %v1188_v44 = vmax.f32 %v3576_v6, 0.0 }
 0x265   :  { %v948_v20 = vpop.f32.mrf.mxu3  ;;  %v1318_v62 = vpop.f32.mrf.mxu0  ;;  %v415_v30 = vadd.f32 %v414_v46, %v3362_v4 }
 0x266   :  { %v949_v21 = vadd.f32 %v3373_v26, %v948_v20  ;;  %v1319_v45 = vadd.f32 %v3549_v59, %v1318_v62 }
 0x267   :  { %485 = vst.msk [vmem:[#allocation2 + $0x178] sm:$0xff] %vm438_vm3, %v415_v30 }
 0x268   :  { %v997_v58 = vadd.f32 %v949_v21, %v3240_v2  ;;  %v1394_v60 = vmax.f32 %v1319_v45, 0.0 }
 0x26a   :  { %v3579_v41 = vadd.f32 %v1083_v61, %v997_v58  ;;  %v1433_v52 = vpack.c.bf16 %v1394_v60, %v1393_v51 }
 0x26c   :  { %v1189_v36 = vmax.f32 %v3579_v41, 0.0  ;;  %2629 = vmatmul.msk.bf16.gmra.mxu1 %vm438_vm3, %v1433_v52  ;;  %v417_v23 = vpop.f32.mrf.mxu1 }
 0x26d   :  { %v951_v11 = vpop.f32.mrf.mxu3  ;;  %v1321_v47 = vpop.f32.mrf.mxu0  ;;  %v418_v24 = vadd.f32 %v417_v23, %v3362_v4 }
 0x26e   :  { %v1219_v22 = vpack.c.bf16 %v1189_v36, %v1188_v44  ;;  %v952_v2 = vadd.f32 %v3373_v26, %v951_v11  ;;  %v1322_v5 = vadd.f32 %v3549_v59, %v1321_v47 }
 0x26f   :  { %487 = vst.msk [vmem:[#allocation2 + $0x188] sm:$0xff] %vm438_vm3, %v418_v24 }
 0x270   :  { %2605 = vmatmul.msk.bf16.gmra.mxu0 %vm438_vm3, %v1219_v22  ;;  %v998_v48 = vadd.f32 %v952_v2, %v3252_v33  ;;  %v1395_v29 = vmax.f32 %v1322_v5, 0.0  ;;  %v1087_v33 = vpop.permute.xlu2 %1086 }
 0x272   :  { %v3594_v34 = vadd.f32 %v1085_v57, %v998_v48  ;;  %v1089_v48 = vpop.permute.xlu0 %1088 }
 0x274   :  { %v419_v21 = vpop.f32.mrf.mxu1  ;;  %v1190_v58 = vmax.f32 %v3594_v34, 0.0 }
 0x275   :  { %v953_v28 = vpop.f32.mrf.mxu3  ;;  %v1323_v31 = vpop.f32.mrf.mxu0  ;;  %v420_v51 = vadd.f32 %v419_v21, %v3362_v4 }
 0x276   :  { %v954_v37 = vadd.f32 %v3373_v26, %v953_v28  ;;  %v1324_v32 = vadd.f32 %v3549_v59, %v1323_v31 }
 0x277   :  { %489 = vst.msk [vmem:[#allocation2 + $0x198] sm:$0xff] %vm438_vm3, %v420_v51 }
 0x278   :  { %v999_v20 = vadd.f32 %v954_v37, %v3258_v42  ;;  %v1396_v62 = vmax.f32 %v1324_v32, 0.0 }
 0x27a   :  { %v3597_v45 = vadd.f32 %v1087_v33, %v999_v20  ;;  %v1434_v50 = vpack.c.bf16 %v1396_v62, %v1395_v29 }
 0x27c   :  { %v1191_v60 = vmax.f32 %v3597_v45, 0.0  ;;  %2630 = vmatmul.msk.bf16.gmra.mxu1 %vm438_vm3, %v1434_v50  ;;  %v422_v30 = vpop.f32.mrf.mxu1 }
 0x27d   :  { %v956_v61 = vpop.f32.mrf.mxu3  ;;  %v1326_v46 = vpop.f32.mrf.mxu0  ;;  %v423_v11 = vadd.f32 %v422_v30, %v3362_v4 }
 0x27e   :  { %v1220_v52 = vpack.c.bf16 %v1191_v60, %v1190_v58  ;;  %v957_v42 = vadd.f32 %v3373_v26, %v956_v61  ;;  %v1327_v36 = vadd.f32 %v3549_v59, %v1326_v46  ;;  %v2791_v61 = vld [vmem:[%s4101_s3 + $0x58] sm:$0xff] }
 0x27f   :  { %491 = vst.msk [vmem:[#allocation2 + $0x1a8] sm:$0xff] %vm438_vm3, %v423_v11  ;;  %1848 = vmatpush.bf16.msrb.mxu2 %v2791_v61 }
 0x280   :  { %2606 = vmatmul.msk.bf16.gmra.mxu0 %vm438_vm3, %v1220_v52  ;;  %v1000_v44 = vadd.f32 %v957_v42, %v3270_v1  ;;  %v1397_v24 = vmax.f32 %v1327_v36, 0.0  ;;  %v1091_v1 = vpop.permute.xlu1 %1090  ;;  %v1093_v36 = vpop.permute.xlu2 %1092 }
 0x282   :  { %v3612_v5 = vadd.f32 %v1089_v48, %v1000_v44 }
 0x284   :  { %v424_v37 = vpop.f32.mrf.mxu1  ;;  %v1192_v20 = vmax.f32 %v3612_v5, 0.0 }
 0x285   :  { %v958_v47 = vpop.f32.mrf.mxu3  ;;  %v1328_v22 = vpop.f32.mrf.mxu0  ;;  %v425_v29 = vadd.f32 %v424_v37, %v3362_v4 }
 0x286   :  { %v959_v2 = vadd.f32 %v3373_v26, %v958_v47  ;;  %v1329_v23 = vadd.f32 %v3549_v59, %v1328_v22 }
 0x287   :  { %493 = vst.msk [vmem:[#allocation2 + $0x1b8] sm:$0xff] %vm438_vm3, %v425_v29 }
 0x288   :  { %v1001_v28 = vadd.f32 %v959_v2, %v3276_v7  ;;  %v1398_v31 = vmax.f32 %v1329_v23, 0.0  ;;  %v1095_v2 = vpop.permute.xlu0 %1094 }
 0x28a   :  { %v3615_v32 = vadd.f32 %v1091_v1, %v1001_v28  ;;  %v1435_v57 = vpack.c.bf16 %v1398_v31, %v1397_v24 }
 0x28c   :  { %v1193_v62 = vmax.f32 %v3615_v32, 0.0  ;;  %2631 = vmatmul.msk.bf16.gmra.mxu1 %vm438_vm3, %v1435_v57  ;;  %v427_v51 = vpop.f32.mrf.mxu1 }
 0x28d   :  { %v961_v33 = vpop.f32.mrf.mxu3  ;;  %v1331_v21 = vpop.f32.mrf.mxu0  ;;  %v428_v46 = vadd.f32 %v427_v51, %v3362_v4 }
 0x28e   :  { %v1221_v50 = vpack.c.bf16 %v1193_v62, %v1192_v20  ;;  %v962_v7 = vadd.f32 %v3373_v26, %v961_v33  ;;  %v1332_v60 = vadd.f32 %v3549_v59, %v1331_v21 }
 0x28f   :  { %495 = vst.msk [vmem:[#allocation2 + $0x1c8] sm:$0xff] %vm438_vm3, %v428_v46 }
 0x290   :  { %2607 = vmatmul.msk.bf16.gmra.mxu0 %vm438_vm3, %v1221_v50  ;;  %v1002_v58 = vadd.f32 %v962_v7, %v3288_v15  ;;  %v1399_v15 = vmax.f32 %v1332_v60, 0.0  ;;  %v1097_v60 = vpop.permute.xlu1 %1096 }
 0x292   :  { %v3633_v11 = vadd.f32 %v1093_v36, %v1002_v58 }
 0x294   :  { %v429_v23 = vpop.f32.mrf.mxu1  ;;  %v1194_v31 = vmax.f32 %v3633_v11, 0.0 }
 0x295   :  { %v963_v52 = vpop.f32.mrf.mxu3  ;;  %v1333_v42 = vpop.f32.mrf.mxu0  ;;  %v430_v28 = vadd.f32 %v429_v23, %v3362_v4 }
 0x296   :  { %v964_v30 = vadd.f32 %v3373_v26, %v963_v52  ;;  %v1334_v44 = vadd.f32 %v3549_v59, %v1333_v42 }
 0x297   :  { %497 = vst.msk [vmem:[#allocation2 + $0x1d8] sm:$0xff] %vm438_vm3, %v430_v28 }
 0x298   :  { %v1003_v47 = vadd.f32 %v964_v30, %v3294_v49  ;;  %v1400_v22 = vmax.f32 %v1334_v44, 0.0  ;;  %v1099_v30 = vpop.permute.xlu2 %1098 }
 0x29a   :  { %v3636_v48 = vadd.f32 %v1095_v2, %v1003_v47  ;;  %v1436_v24 = vpack.c.bf16 %v1400_v22, %v1399_v15 }
 0x29c   :  { %v1195_v1 = vmax.f32 %v3636_v48, 0.0  ;;  %2632 = vmatmul.msk.bf16.gmra.mxu1 %vm438_vm3, %v1436_v24  ;;  %v432_v20 = vpop.f32.mrf.mxu1 }
 0x29d   :  { %v966_v37 = vpop.f32.mrf.mxu3  ;;  %v1336_v57 = vpop.f32.mrf.mxu0  ;;  %v433_v62 = vadd.f32 %v432_v20, %v3362_v4 }
 0x29e   :  { %v1222_v29 = vpack.c.bf16 %v1195_v1, %v1194_v31  ;;  %v967_v49 = vadd.f32 %v3373_v26, %v966_v37  ;;  %v1337_v21 = vadd.f32 %v3549_v59, %v1336_v57 }
 0x29f   :  { %499 = vst.msk [vmem:[#allocation2 + $0x1e8] sm:$0xff] %vm438_vm3, %v433_v62 }
 0x2a0   :  { %2608 = vmatmul.msk.bf16.gmra.mxu0 %vm438_vm3, %v1222_v29  ;;  %v1004_v33 = vadd.f32 %v967_v49, %v3309_v3  ;;  %v1401_v46 = vmax.f32 %v1337_v21, 0.0  ;;  %v1101_v29 = vpop.permute.xlu0 %1100  ;;  %v1103_v21 = vpop.permute.xlu1 %1102 }
 0x2a2   :  { %v3651_v61 = vadd.f32 %v1097_v60, %v1004_v33  ;;  %v2790_v60 = vld [vmem:[%s4101_s3 + $0x50] sm:$0xff] }
 0x2a3   :  { %1849 = vmatpush.bf16.msrb.mxu2 %v2790_v60 }
 0x2a4   :  { %v434_v44 = vpop.f32.mrf.mxu1  ;;  %v1196_v47 = vmax.f32 %v3651_v61, 0.0 }
 0x2a5   :  { %v968_v50 = vpop.f32.mrf.mxu3  ;;  %v1338_v7 = vpop.f32.mrf.mxu0  ;;  %v435_v15 = vadd.f32 %v434_v44, %v3362_v4 }
 0x2a6   :  { %v969_v51 = vadd.f32 %v3373_v26, %v968_v50  ;;  %v1339_v58 = vadd.f32 %v3549_v59, %v1338_v7 }
 0x2a7   :  { %501 = vst.msk [vmem:[#allocation2 + $0x1f8] sm:$0xff] %vm438_vm3, %v435_v15 }
 0x2a8   :  { %v1005_v52 = vadd.f32 %v969_v51, %v3315_v18  ;;  %v1402_v42 = vmax.f32 %v1339_v58, 0.0 }
 0x2aa   :  { %v3654_v3 = vadd.f32 %v1099_v30, %v1005_v52  ;;  %v1437_v36 = vpack.c.bf16 %v1402_v42, %v1401_v46  ;;  %v2788_v30 = vld [vmem:[%s4101_s3 + $0x40] sm:$0xff] }
 0x2ac   :  { %v1197_v22 = vmax.f32 %v3654_v3, 0.0  ;;  %2633 = vmatmul.msk.bf16.gmra.mxu1 %vm438_vm3, %v1437_v36 }
 0x2ad   :  { %v971_v2 = vpop.f32.mrf.mxu3  ;;  %v1341_v23 = vpop.f32.mrf.mxu0 }
 0x2ae   :  { %v1223_v24 = vpack.c.bf16 %v1197_v22, %v1196_v47  ;;  %v972_v18 = vadd.f32 %v3373_v26, %v971_v2  ;;  %v1342_v31 = vadd.f32 %v3549_v59, %v1341_v23 }
 0x2b0   :  { %2609 = vmatmul.msk.bf16.gmra.mxu0 %vm438_vm3, %v1223_v24  ;;  %v1006_v28 = vadd.f32 %v972_v18, %v3327_v53  ;;  %v1403_v20 = vmax.f32 %v1342_v31, 0.0 }
 0x2b2   :  { %v3667_v49 = vadd.f32 %v1101_v29, %v1006_v28  ;;  %v3693_v28 = vld [vmem:[%s4104_s6 + $0x1] ss:$0 sm:$0xff] }
 0x2b4   :  { %v1198_v53 = vmax.f32 %v3667_v49, 0.0 }
 0x2b5   :  { %v973_v4 = vpop.f32.mrf.mxu3  ;;  %v1343_v1 = vpop.f32.mrf.mxu0 }
 0x2b6   :  { %v974_v37 = vadd.f32 %v3373_v26, %v973_v4  ;;  %v1344_v57 = vadd.f32 %v3549_v59, %v1343_v1 }
 0x2b8   :  { %v1007_v62 = vadd.f32 %v974_v37, %v3333_v63  ;;  %v1404_v33 = vmax.f32 %v1344_v57, 0.0  ;;  %v2789_v63 = vld [vmem:[%s4101_s3 + $0x48] sm:$0xff] }
 0x2b9   :  { %1850 = vmatpush.bf16.msrb.mxu2 %v2789_v63 }
 0x2ba   :  { %v3670_v50 = vadd.f32 %v1103_v21, %v1007_v62  ;;  %v1438_v7 = vpack.c.bf16 %v1404_v33, %v1403_v20  ;;  %v1646_v62 = vld [vmem:[#allocation2 + $0x8] sm:$0xff] }
 0x2bc   :  { %v1199_v51 = vmax.f32 %v3670_v50, 0.0  ;;  %2634 = vmatmul.msk.bf16.gmra.mxu1 %vm438_vm3, %v1438_v7 }
 0x2bd   :  { %v1346_v26 = vpop.f32.mrf.mxu0  ;;  %1851 = vmatpush.bf16.msrb.mxu2 %v2788_v30 }
 0x2be   :  { %v1224_v58 = vpack.c.bf16 %v1199_v51, %v1198_v53  ;;  %v1347_v46 = vadd.f32 %v3549_v59, %v1346_v26  ;;  %v1647_v53 = vld [vmem:[#allocation2 + $0x18] sm:$0xff] }
 0x2c0   :  { %2610 = vmatmul.msk.bf16.gmra.mxu0 %vm438_vm3, %v1224_v58  ;;  %v1405_v44 = vmax.f32 %v1347_v46, 0.0 }
 0x2c5   :  { %v1348_v52 = vpop.f32.mrf.mxu0 }
 0x2c6   :  { %v1349_v42 = vadd.f32 %v3549_v59, %v1348_v52 }
 0x2c8   :  { %v1406_v36 = vmax.f32 %v1349_v42, 0.0 }
 0x2ca   :  { %v1439_v15 = vpack.c.bf16 %v1406_v36, %v1405_v44 }
 0x2cc   :  { %2635 = vmatmul.msk.bf16.gmra.mxu1 %vm438_vm3, %v1439_v15 }
 0x2cd   :  { %v1351_v47 = vpop.f32.mrf.mxu0 }
 0x2ce   :  { %v1352_v22 = vadd.f32 %v3549_v59, %v1351_v47 }
 0x2d0   :  { %v1407_v24 = vmax.f32 %v1352_v22, 0.0  ;;  %v1648_v22 = vld [vmem:[#allocation2 + $0x28] sm:$0xff] }
 0x2d5   :  { %v1353_v2 = vpop.f32.mrf.mxu0 }
 0x2d6   :  { %v1354_v23 = vadd.f32 %v3549_v59, %v1353_v2 }
 0x2d8   :  { %v1408_v18 = vmax.f32 %v1354_v23, 0.0 }
 0x2d9   :  { %v1534_v31 = vpop.f32.mrf.mxu1 }
 0x2da   :  { %v1440_v4 = vpack.c.bf16 %v1408_v18, %v1407_v24  ;;  %v1535_v1 = vadd.f32 %v3693_v28, %v1534_v31  ;;  %v1649_v18 = vld [vmem:[#allocation2 + $0x38] sm:$0xff] }
 0x2dc   :  { %2636 = vmatmul.msk.bf16.gmra.mxu1 %vm438_vm3, %v1440_v4  ;;  %v1614_v57 = vadd.f32 %v1535_v1, %v3385_v19 }
 0x2dd   :  { %v1356_v37 = vpop.f32.mrf.mxu0 }
 0x2de   :  { %v3699_v33 = vadd.f32 %v1646_v62, %v1614_v57  ;;  %v1357_v21 = vadd.f32 %v3549_v59, %v1356_v37 }
 0x2e0   :  { %v1710_v60 = vmax.f32 %v3699_v33, 0.0  ;;  %v1409_v63 = vmax.f32 %v1357_v21, 0.0 }
 0x2e1   :  { %v1536_v29 = vpop.f32.mrf.mxu1 }
 0x2e2   :  { %v1537_v20 = vadd.f32 %v3693_v28, %v1536_v29 }
 0x2e4   :  { %v1615_v7 = vadd.f32 %v1537_v20, %v3388_v12 }
 0x2e5   :  { %v1358_v51 = vpop.f32.mrf.mxu0 }
 0x2e6   :  { %v3703_v26 = vadd.f32 %v1647_v53, %v1615_v7  ;;  %v1359_v58 = vadd.f32 %v3549_v59, %v1358_v51 }
 0x2e8   :  { %v1711_v19 = vmax.f32 %v3703_v26, 0.0  ;;  %v1410_v46 = vmax.f32 %v1359_v58, 0.0 }
 0x2e9   :  { %v1539_v52 = vpop.f32.mrf.mxu1 }
 0x2ea   :  { %v1751_v42 = vpack.c.bf16 %v1711_v19, %v1710_v60  ;;  %v1441_v30 = vpack.c.bf16 %v1410_v46, %v1409_v63  ;;  %v1540_v44 = vadd.f32 %v3693_v28, %v1539_v52  ;;  %v1650_v60 = vld [vmem:[#allocation2 + $0x48] sm:$0xff]  ;;  %v1651_v52 = vld [vmem:[#allocation2 + $0x58] sm:$0xff] }
 0x2ec   :  { %2637 = vmatmul.msk.bf16.gmra.mxu1 %vm438_vm3, %v1441_v30  ;;  %2669 = vmatmul.msk.bf16.vlgmr.msrb.gmra.mxu2 %vm438_vm3, %v1751_v42  ;;  %v1616_v36 = vadd.f32 %v1540_v44, %v3405_v25 }
 0x2ed   :  { %v1361_v12 = vpop.f32.mrf.mxu0 }
 0x2ee   :  { %v3713_v2 = vadd.f32 %v1648_v22, %v1616_v36  ;;  %v1362_v23 = vadd.f32 %v3549_v59, %v1361_v12 }
 0x2f0   :  { %v1712_v37 = vmax.f32 %v3713_v2, 0.0  ;;  %v1411_v57 = vmax.f32 %v1362_v23, 0.0 }
 0x2f1   :  { %v1541_v15 = vpop.f32.mrf.mxu1 }
 0x2f2   :  { %v1542_v47 = vadd.f32 %v3693_v28, %v1541_v15 }
 0x2f4   :  { %v1617_v24 = vadd.f32 %v1542_v47, %v3408_v9 }
 0x2f5   :  { %v1363_v31 = vpop.f32.mrf.mxu0 }
 0x2f6   :  { %v3717_v4 = vadd.f32 %v1649_v18, %v1617_v24  ;;  %v1364_v1 = vadd.f32 %v3549_v59, %v1363_v31 }
 0x2f8   :  { %v1713_v25 = vmax.f32 %v3717_v4, 0.0  ;;  %v1412_v29 = vmax.f32 %v1364_v1, 0.0 }
 0x2f9   :  { %v1544_v20 = vpop.f32.mrf.mxu1 }
 0x2fa   :  { %v1442_v62 = vpack.c.bf16 %v1412_v29, %v1411_v57  ;;  %v1752_v21 = vpack.c.bf16 %v1713_v25, %v1712_v37  ;;  %v1545_v7 = vadd.f32 %v3693_v28, %v1544_v20  ;;  %v1652_v37 = vld [vmem:[#allocation2 + $0x68] sm:$0xff]  ;;  %v1653_v20 = vld [vmem:[#allocation2 + $0x78] sm:$0xff] }
 0x2fc   :  { %2638 = vmatmul.msk.bf16.gmra.mxu1 %vm438_vm3, %v1442_v62  ;;  %2670 = vmatmul.msk.bf16.gmra.mxu2 %vm438_vm3, %v1752_v21  ;;  %v1618_v53 = vadd.f32 %v1545_v7, %v3425_v55 }
 0x2fd   :  { %v1366_v9 = vpop.f32.mrf.mxu0 }
 0x2fe   :  { %v3727_v63 = vadd.f32 %v1650_v60, %v1618_v53  ;;  %v1367_v19 = vadd.f32 %v3549_v59, %v1366_v9 }
 0x300   :  { %v1714_v12 = vmax.f32 %v3727_v63, 0.0  ;;  %v1413_v36 = vmax.f32 %v1367_v19, 0.0 }
 0x301   :  { %v1546_v51 = vpop.f32.mrf.mxu1 }
 0x302   :  { %v1547_v58 = vadd.f32 %v3693_v28, %v1546_v51 }
 0x304   :  { %v1619_v46 = vadd.f32 %v1547_v58, %v3428_v38 }
 0x305   :  { %v1368_v42 = vpop.f32.mrf.mxu0 }
 0x306   :  { %v3731_v30 = vadd.f32 %v1651_v52, %v1619_v46  ;;  %v1369_v44 = vadd.f32 %v3549_v59, %v1368_v42  ;;  %v2795_v42 = vld [vmem:[#allocation4 + $0x58] sm:$0xff] }
 0x307   :  { %2071 = vmatpush.bf16.msrb.mxu3 %v2795_v42 }
 0x308   :  { %v1715_v55 = vmax.f32 %v3731_v30, 0.0  ;;  %v1414_v15 = vmax.f32 %v1369_v44, 0.0 }
 0x309   :  { %v1549_v47 = vpop.f32.mrf.mxu1 }
 0x30a   :  { %v1443_v22 = vpack.c.bf16 %v1414_v15, %v1413_v36  ;;  %v1753_v23 = vpack.c.bf16 %v1715_v55, %v1714_v12  ;;  %v1550_v24 = vadd.f32 %v3693_v28, %v1549_v47  ;;  %v1654_v36 = vld [vmem:[#allocation2 + $0x88] sm:$0xff] }
 0x30c   :  { %2639 = vmatmul.msk.bf16.gmra.mxu1 %vm438_vm3, %v1443_v22  ;;  %2671 = vmatmul.msk.bf16.gmra.mxu2 %vm438_vm3, %v1753_v23  ;;  %v1620_v18 = vadd.f32 %v1550_v24, %v3445_v17  ;;  %v1655_v22 = vld [vmem:[#allocation2 + $0x98] sm:$0xff] }
 0x30d   :  { %v1371_v38 = vpop.f32.mrf.mxu0 }
 0x30e   :  { %v3741_v57 = vadd.f32 %v1652_v37, %v1620_v18  ;;  %v1372_v25 = vadd.f32 %v3549_v59, %v1371_v38 }
 0x310   :  { %v1716_v9 = vmax.f32 %v3741_v57, 0.0  ;;  %v1415_v53 = vmax.f32 %v1372_v25, 0.0 }
 0x311   :  { %v1551_v31 = vpop.f32.mrf.mxu1 }
 0x312   :  { %v1552_v1 = vadd.f32 %v3693_v28, %v1551_v31 }
 0x314   :  { %v1621_v29 = vadd.f32 %v1552_v1, %v3448_v14 }
 0x315   :  { %v1373_v62 = vpop.f32.mrf.mxu0 }
 0x316   :  { %v3745_v21 = vadd.f32 %v1653_v20, %v1621_v29  ;;  %v1374_v7 = vadd.f32 %v3549_v59, %v1373_v62 }
 0x318   :  { %v1717_v17 = vmax.f32 %v3745_v21, 0.0  ;;  %v1416_v51 = vmax.f32 %v1374_v7, 0.0 }
 0x319   :  { %v1554_v58 = vpop.f32.mrf.mxu1 }
 0x31a   :  { %v1444_v60 = vpack.c.bf16 %v1416_v51, %v1415_v53  ;;  %v1754_v19 = vpack.c.bf16 %v1717_v17, %v1716_v9  ;;  %v1555_v46 = vadd.f32 %v3693_v28, %v1554_v58  ;;  %v1656_v53 = vld [vmem:[#allocation2 + $0xa8] sm:$0xff] }
 0x31c   :  { %2640 = vmatmul.msk.bf16.gmra.mxu1 %vm438_vm3, %v1444_v60  ;;  %2672 = vmatmul.msk.bf16.gmra.mxu2 %vm438_vm3, %v1754_v19  ;;  %v1622_v52 = vadd.f32 %v1555_v46, %v3465_v43  ;;  %v1657_v60 = vld [vmem:[#allocation2 + $0xb8] sm:$0xff] }
 0x31d   :  { %v1376_v14 = vpop.f32.mrf.mxu0 }
 0x31e   :  { %v3755_v55 = vadd.f32 %v1654_v36, %v1622_v52  ;;  %v1377_v15 = vadd.f32 %v3549_v59, %v1376_v14 }
 0x320   :  { %v1718_v43 = vmax.f32 %v3755_v55, 0.0  ;;  %v1417_v18 = vmax.f32 %v1377_v15, 0.0 }
 0x321   :  { %v1556_v44 = vpop.f32.mrf.mxu1 }
 0x322   :  { %v1557_v12 = vadd.f32 %v3693_v28, %v1556_v44 }
 0x324   :  { %v1623_v47 = vadd.f32 %v1557_v12, %v3468_v54 }
 0x325   :  { %v1378_v23 = vpop.f32.mrf.mxu0 }
 0x326   :  { %v3759_v24 = vadd.f32 %v1655_v22, %v1623_v47  ;;  %v1379_v38 = vadd.f32 %v3549_v59, %v1378_v23 }
 0x328   :  { %v1719_v31 = vmax.f32 %v3759_v24, 0.0  ;;  %v1418_v1 = vmax.f32 %v1379_v38, 0.0 }
 0x329   :  { %v1559_v37 = vpop.f32.mrf.mxu1 }
 0x32a   :  { %v1445_v25 = vpack.c.bf16 %v1418_v1, %v1417_v18  ;;  %v1755_v29 = vpack.c.bf16 %v1719_v31, %v1718_v43  ;;  %v1560_v20 = vadd.f32 %v3693_v28, %v1559_v37  ;;  %v1658_v43 = vld [vmem:[#allocation2 + $0xc8] sm:$0xff]  ;;  %v1659_v37 = vld [vmem:[#allocation2 + $0xd8] sm:$0xff] }
 0x32c   :  { %2641 = vmatmul.msk.bf16.gmra.mxu1 %vm438_vm3, %v1445_v25  ;;  %2673 = vmatmul.msk.bf16.gmra.mxu2 %vm438_vm3, %v1755_v29  ;;  %v1624_v62 = vadd.f32 %v1560_v20, %v3485_v40 }
 0x32d   :  { %v1381_v54 = vpop.f32.mrf.mxu0 }
 0x32e   :  { %v3769_v17 = vadd.f32 %v1656_v53, %v1624_v62  ;;  %v1382_v51 = vadd.f32 %v3549_v59, %v1381_v54 }
 0x330   :  { %v1720_v52 = vmax.f32 %v3769_v17, 0.0  ;;  %v1419_v42 = vmax.f32 %v1382_v51, 0.0 }
 0x331   :  { %v1561_v7 = vpop.f32.mrf.mxu1 }
 0x332   :  { %v1562_v9 = vadd.f32 %v3693_v28, %v1561_v7 }
 0x334   :  { %v1625_v58 = vadd.f32 %v1562_v9, %v3488_v39 }
 0x335   :  { %v1383_v19 = vpop.f32.mrf.mxu0 }
 0x336   :  { %v3773_v46 = vadd.f32 %v1657_v60, %v1625_v58  ;;  %v1384_v14 = vadd.f32 %v3549_v59, %v1383_v19  ;;  %v2794_v19 = vld [vmem:[#allocation4 + $0x50] sm:$0xff] }
 0x337   :  { %2072 = vmatpush.bf16.msrb.mxu3 %v2794_v19  ;;  %v1665_v19 = vld [vmem:[#allocation2 + $0x138] sm:$0xff] }
 0x338   :  { %v1721_v40 = vmax.f32 %v3773_v46, 0.0  ;;  %v1420_v44 = vmax.f32 %v1384_v14, 0.0  ;;  %v1660_v14 = vld [vmem:[#allocation2 + $0xe8] sm:$0xff] }
 0x339   :  { %v1564_v12 = vpop.f32.mrf.mxu1 }
 0x33a   :  { %v1446_v36 = vpack.c.bf16 %v1420_v44, %v1419_v42  ;;  %v1756_v15 = vpack.c.bf16 %v1721_v40, %v1720_v52  ;;  %v1565_v47 = vadd.f32 %v3693_v28, %v1564_v12  ;;  %v1661_v40 = vld [vmem:[#allocation2 + $0xf8] sm:$0xff]  ;;  %v2793_v44 = vld [vmem:[#allocation4 + $0x48] sm:$0xff] }
 0x33b   :  { %2073 = vmatpush.bf16.msrb.mxu3 %v2793_v44 }
 0x33c   :  { %2642 = vmatmul.msk.bf16.gmra.mxu1 %vm438_vm3, %v1446_v36  ;;  %2674 = vmatmul.msk.bf16.gmra.mxu2 %vm438_vm3, %v1756_v15  ;;  %v1626_v22 = vadd.f32 %v1565_v47, %v3505_v13  ;;  %v2792_v47 = vld [vmem:[#allocation4 + $0x40] sm:$0xff] }
 0x33d   :  { %v1386_v39 = vpop.f32.mrf.mxu0 }
 0x33e   :  { %v3783_v18 = vadd.f32 %v1658_v43, %v1626_v22  ;;  %v1387_v31 = vadd.f32 %v3549_v59, %v1386_v39  ;;  %v1662_v43 = vld [vmem:[#allocation2 + $0x108] sm:$0xff] }
 0x33f   :  { %2074 = vmatpush.bf16.msrb.mxu3 %v2792_v47 }
 0x340   :  { %v1722_v54 = vmax.f32 %v3783_v18, 0.0  ;;  %v1421_v62 = vmax.f32 %v1387_v31, 0.0 }
 0x341   :  { %v1566_v23 = vpop.f32.mrf.mxu1 }
 0x342   :  { %v1567_v38 = vadd.f32 %v3693_v28, %v1566_v23 }
 0x344   :  { %v1627_v1 = vadd.f32 %v1567_v38, %v3508_v27 }
 0x345   :  { %v1388_v25 = vpop.f32.mrf.mxu0 }
 0x346   :  { %v3787_v29 = vadd.f32 %v1659_v37, %v1627_v1  ;;  %v1389_v20 = vadd.f32 %v3549_v59, %v1388_v25  ;;  %v1663_v37 = vld [vmem:[#allocation2 + $0x118] sm:$0xff] }
 0x348   :  { %v1723_v13 = vmax.f32 %v3787_v29, 0.0  ;;  %v1422_v7 = vmax.f32 %v1389_v20, 0.0 }
 0x349   :  { %v1569_v9 = vpop.f32.mrf.mxu1 }
 0x34a   :  { %v1447_v53 = vpack.c.bf16 %v1422_v7, %v1421_v62  ;;  %v1757_v51 = vpack.c.bf16 %v1723_v13, %v1722_v54  ;;  %v1570_v58 = vadd.f32 %v3693_v28, %v1569_v9 }
 0x34c   :  { %2643 = vmatmul.msk.bf16.gmra.mxu1 %vm438_vm3, %v1447_v53  ;;  %2675 = vmatmul.msk.bf16.gmra.mxu2 %vm438_vm3, %v1757_v51  ;;  %v1628_v27 = vadd.f32 %v1570_v58, %v3521_v10  ;;  %v1664_v58 = vld [vmem:[#allocation2 + $0x128] sm:$0xff] }
 0x34e   :  { %v3797_v52 = vadd.f32 %v1660_v14, %v1628_v27 }
 0x350   :  { %v1724_v36 = vmax.f32 %v3797_v52, 0.0 }
 0x351   :  { %v1571_v60 = vpop.f32.mrf.mxu1 }
 0x352   :  { %v1572_v59 = vadd.f32 %v3693_v28, %v1571_v60 }
 0x354   :  { %v1629_v42 = vadd.f32 %v1572_v59, %v3524_v16 }
 0x356   :  { %v3800_v12 = vadd.f32 %v1661_v40, %v1629_v42 }
 0x358   :  { %v1725_v15 = vmax.f32 %v3800_v12, 0.0 }
 0x359   :  { %v1574_v10 = vpop.f32.mrf.mxu1 }
 0x35a   :  { %v1758_v39 = vpack.c.bf16 %v1725_v15, %v1724_v36  ;;  %v1575_v22 = vadd.f32 %v3693_v28, %v1574_v10 }
 0x35c   :  { %2676 = vmatmul.msk.bf16.gmra.mxu2 %vm438_vm3, %v1758_v39  ;;  %v1630_v23 = vadd.f32 %v1575_v22, %v3536_v35 }
 0x35e   :  { %v3808_v31 = vadd.f32 %v1662_v43, %v1630_v23  ;;  %v1666_v43 = vld [vmem:[#allocation2 + $0x148] sm:$0xff] }
 0x360   :  { %v1726_v20 = vmax.f32 %v3808_v31, 0.0 }
 0x361   :  { %v1576_v16 = vpop.f32.mrf.mxu1 }
 0x362   :  { %v1577_v38 = vadd.f32 %v3693_v28, %v1576_v16 }
 0x364   :  { %v1631_v1 = vadd.f32 %v1577_v38, %v3539_v8  ;;  %v3821_v8 = vld [vmem:[%s4102_s4 + $0x2] ss:$0 sm:$0xff] }
 0x366   :  { %v3811_v25 = vadd.f32 %v1663_v37, %v1631_v1 }
 0x368   :  { %v1727_v54 = vmax.f32 %v3811_v25, 0.0 }
 0x369   :  { %v1579_v62 = vpop.f32.mrf.mxu1 }
 0x36a   :  { %v1759_v13 = vpack.c.bf16 %v1727_v54, %v1726_v20  ;;  %v1580_v7 = vadd.f32 %v3693_v28, %v1579_v62  ;;  %v1667_v20 = vld [vmem:[#allocation2 + $0x158] sm:$0xff] }
 0x36c   :  { %2677 = vmatmul.msk.bf16.gmra.mxu2 %vm438_vm3, %v1759_v13  ;;  %v1632_v9 = vadd.f32 %v1580_v7, %v3558_v0 }
 0x36e   :  { %v3824_v27 = vadd.f32 %v1664_v58, %v1632_v9 }
 0x36f   :  { %v1853_v35 = vpop.f32.mrf.mxu2 }
 0x370   :  { %v1854_v59 = vadd.f32 %v3821_v8, %v1853_v35  ;;  %v1728_v0 = vmax.f32 %v3824_v27, 0.0 }
 0x371   :  { %v1581_v53 = vpop.f32.mrf.mxu1 }
 0x372   :  { %v1582_v51 = vadd.f32 %v3693_v28, %v1581_v53  ;;  %v1933_v15 = vmax.f32 %v1854_v59, 0.0 }
 0x374   :  { %v1633_v60 = vadd.f32 %v1582_v51, %v3561_v56 }
 0x376   :  { %v3828_v14 = vadd.f32 %v1665_v19, %v1633_v60 }
 0x377   :  { %v1855_v42 = vpop.f32.mrf.mxu2 }
 0x378   :  { %v1729_v40 = vmax.f32 %v3828_v14, 0.0  ;;  %v1856_v44 = vadd.f32 %v3821_v8, %v1855_v42 }
 0x379   :  { %v1584_v36 = vpop.f32.mrf.mxu1 }
 0x37a   :  { %v1934_v10 = vmax.f32 %v1856_v44, 0.0  ;;  %v1760_v47 = vpack.c.bf16 %v1729_v40, %v1728_v0  ;;  %v1585_v22 = vadd.f32 %v3693_v28, %v1584_v36  ;;  %v1668_v40 = vld [vmem:[#allocation2 + $0x168] sm:$0xff] }
 0x37c   :  { %v1974_v39 = vpack.c.bf16 %v1934_v10, %v1933_v15  ;;  %2678 = vmatmul.msk.bf16.gmra.mxu2 %vm438_vm3, %v1760_v47  ;;  %v1634_v23 = vadd.f32 %v1585_v22, %v3576_v6  ;;  %v1669_v15 = vld [vmem:[#allocation2 + $0x178] sm:$0xff] }
 0x37e   :  { %2702 = vmatmul.msk.bf16.vlgmr.msrb.gmra.mxu3 %vm438_vm3, %v1974_v39  ;;  %v3838_v1 = vadd.f32 %v1666_v43, %v1634_v23 }
 0x37f   :  { %v1858_v56 = vpop.f32.mrf.mxu2 }
 0x380   :  { %v1859_v54 = vadd.f32 %v3821_v8, %v1858_v56  ;;  %v1730_v7 = vmax.f32 %v3838_v1, 0.0 }
 0x381   :  { %v1586_v16 = vpop.f32.mrf.mxu1 }
 0x382   :  { %v1587_v38 = vadd.f32 %v3693_v28, %v1586_v16  ;;  %v1935_v53 = vmax.f32 %v1859_v54, 0.0 }
 0x384   :  { %v1635_v37 = vadd.f32 %v1587_v38, %v3579_v41 }
 0x386   :  { %v3842_v62 = vadd.f32 %v1667_v20, %v1635_v37 }
 0x387   :  { %v1860_v13 = vpop.f32.mrf.mxu2 }
 0x388   :  { %v1731_v35 = vmax.f32 %v3842_v62, 0.0  ;;  %v1861_v6 = vadd.f32 %v3821_v8, %v1860_v13 }
 0x389   :  { %v1589_v9 = vpop.f32.mrf.mxu1 }
 0x38a   :  { %v1936_v51 = vmax.f32 %v1861_v6, 0.0  ;;  %v1761_v58 = vpack.c.bf16 %v1731_v35, %v1730_v7  ;;  %v1590_v19 = vadd.f32 %v3693_v28, %v1589_v9  ;;  %v1670_v35 = vld [vmem:[#allocation2 + $0x188] sm:$0xff] }
 0x38c   :  { %v1975_v60 = vpack.c.bf16 %v1936_v51, %v1935_v53  ;;  %2679 = vmatmul.msk.bf16.gmra.mxu2 %vm438_vm3, %v1761_v58  ;;  %v1636_v59 = vadd.f32 %v1590_v19, %v3594_v34  ;;  %v1671_v53 = vld [vmem:[#allocation2 + $0x198] sm:$0xff] }
 0x38e   :  { %2703 = vmatmul.msk.bf16.gmra.mxu3 %vm438_vm3, %v1975_v60  ;;  %v3852_v44 = vadd.f32 %v1668_v40, %v1636_v59 }
 0x38f   :  { %v1863_v41 = vpop.f32.mrf.mxu2 }
 0x390   :  { %v1864_v10 = vadd.f32 %v3821_v8, %v1863_v41  ;;  %v1732_v22 = vmax.f32 %v3852_v44, 0.0 }
 0x391   :  { %v1591_v42 = vpop.f32.mrf.mxu1 }
 0x392   :  { %v1592_v0 = vadd.f32 %v3693_v28, %v1591_v42  ;;  %v1937_v16 = vmax.f32 %v1864_v10, 0.0 }
 0x394   :  { %v1637_v36 = vadd.f32 %v1592_v0, %v3597_v45 }
 0x396   :  { %v3856_v47 = vadd.f32 %v1669_v15, %v1637_v36 }
 0x397   :  { %v1865_v39 = vpop.f32.mrf.mxu2 }
 0x398   :  { %v1733_v56 = vmax.f32 %v3856_v47, 0.0  ;;  %v1866_v34 = vadd.f32 %v3821_v8, %v1865_v39 }
 0x399   :  { %v1594_v23 = vpop.f32.mrf.mxu1 }
 0x39a   :  { %v1938_v38 = vmax.f32 %v1866_v34, 0.0  ;;  %v1762_v43 = vpack.c.bf16 %v1733_v56, %v1732_v22  ;;  %v1595_v20 = vadd.f32 %v3693_v28, %v1594_v23  ;;  %v1672_v56 = vld [vmem:[#allocation2 + $0x1a8] sm:$0xff] }
 0x39c   :  { %v1976_v37 = vpack.c.bf16 %v1938_v38, %v1937_v16  ;;  %2680 = vmatmul.msk.bf16.gmra.mxu2 %vm438_vm3, %v1762_v43  ;;  %v1638_v54 = vadd.f32 %v1595_v20, %v3612_v5  ;;  %v1673_v16 = vld [vmem:[#allocation2 + $0x1b8] sm:$0xff] }
 0x39e   :  { %2704 = vmatmul.msk.bf16.gmra.mxu3 %vm438_vm3, %v1976_v37  ;;  %v3866_v6 = vadd.f32 %v1670_v35, %v1638_v54 }
 0x39f   :  { %v1868_v45 = vpop.f32.mrf.mxu2 }
 0x3a0   :  { %v1869_v51 = vadd.f32 %v3821_v8, %v1868_v45  ;;  %v1734_v19 = vmax.f32 %v3866_v6, 0.0 }
 0x3a1   :  { %v1596_v13 = vpop.f32.mrf.mxu1 }
 0x3a2   :  { %v1597_v7 = vadd.f32 %v3693_v28, %v1596_v13  ;;  %v1939_v42 = vmax.f32 %v1869_v51, 0.0 }
 0x3a4   :  { %v1639_v9 = vadd.f32 %v1597_v7, %v3615_v32 }
 0x3a6   :  { %v3870_v58 = vadd.f32 %v1671_v53, %v1639_v9 }
 0x3a7   :  { %v1870_v60 = vpop.f32.mrf.mxu2 }
 0x3a8   :  { %v1735_v41 = vmax.f32 %v3870_v58, 0.0  ;;  %v1871_v5 = vadd.f32 %v3821_v8, %v1870_v60 }
 0x3a9   :  { %v1599_v59 = vpop.f32.mrf.mxu1 }
 0x3aa   :  { %v1940_v0 = vmax.f32 %v1871_v5, 0.0  ;;  %v1763_v40 = vpack.c.bf16 %v1735_v41, %v1734_v19  ;;  %v1600_v15 = vadd.f32 %v3693_v28, %v1599_v59  ;;  %v1674_v41 = vld [vmem:[#allocation2 + $0x1c8] sm:$0xff] }
 0x3ac   :  { %v1977_v36 = vpack.c.bf16 %v1940_v0, %v1939_v42  ;;  %2681 = vmatmul.msk.bf16.gmra.mxu2 %vm438_vm3, %v1763_v40  ;;  %v1640_v10 = vadd.f32 %v1600_v15, %v3633_v11  ;;  %v1675_v42 = vld [vmem:[#allocation2 + $0x1d8] sm:$0xff] }
 0x3ae   :  { %2705 = vmatmul.msk.bf16.gmra.mxu3 %vm438_vm3, %v1977_v36  ;;  %v3880_v34 = vadd.f32 %v1672_v56, %v1640_v10 }
 0x3af   :  { %v1873_v32 = vpop.f32.mrf.mxu2 }
 0x3b0   :  { %v1874_v38 = vadd.f32 %v3821_v8, %v1873_v32  ;;  %v1736_v20 = vmax.f32 %v3880_v34, 0.0 }
 0x3b1   :  { %v1601_v39 = vpop.f32.mrf.mxu1 }
 0x3b2   :  { %v1602_v22 = vadd.f32 %v3693_v28, %v1601_v39  ;;  %v1941_v13 = vmax.f32 %v1874_v38, 0.0 }
 0x3b4   :  { %v1641_v23 = vadd.f32 %v1602_v22, %v3636_v48 }
 0x3b6   :  { %v3884_v43 = vadd.f32 %v1673_v16, %v1641_v23 }
 0x3b7   :  { %v1875_v37 = vpop.f32.mrf.mxu2 }
 0x3b8   :  { %v1737_v45 = vmax.f32 %v3884_v43, 0.0  ;;  %v1876_v11 = vadd.f32 %v3821_v8, %v1875_v37 }
 0x3b9   :  { %v1604_v54 = vpop.f32.mrf.mxu1 }
 0x3ba   :  { %v1942_v7 = vmax.f32 %v1876_v11, 0.0  ;;  %v1764_v35 = vpack.c.bf16 %v1737_v45, %v1736_v20  ;;  %v1605_v53 = vadd.f32 %v3693_v28, %v1604_v54  ;;  %v1676_v45 = vld [vmem:[#allocation2 + $0x1e8] sm:$0xff] }
 0x3bc   :  { %v1978_v9 = vpack.c.bf16 %v1942_v7, %v1941_v13  ;;  %2682 = vmatmul.msk.bf16.gmra.mxu2 %vm438_vm3, %v1764_v35  ;;  %v1642_v51 = vadd.f32 %v1605_v53, %v3651_v61  ;;  %v1677_v13 = vld [vmem:[#allocation2 + $0x1f8] sm:$0xff] }
 0x3be   :  { %2706 = vmatmul.msk.bf16.gmra.mxu3 %vm438_vm3, %v1978_v9  ;;  %v3894_v5 = vadd.f32 %v1674_v41, %v1642_v51 }
 0x3bf   :  { %v1878_v48 = vpop.f32.mrf.mxu2 }
 0x3c0   :  { %v1879_v0 = vadd.f32 %v3821_v8, %v1878_v48  ;;  %v1738_v15 = vmax.f32 %v3894_v5, 0.0 }
 0x3c1   :  { %v1606_v60 = vpop.f32.mrf.mxu1 }
 0x3c2   :  { %v1607_v19 = vadd.f32 %v3693_v28, %v1606_v60  ;;  %v1943_v39 = vmax.f32 %v1879_v0, 0.0 }
 0x3c4   :  { %v1643_v59 = vadd.f32 %v1607_v19, %v3654_v3 }
 0x3c6   :  { %v3898_v40 = vadd.f32 %v1675_v42, %v1643_v59 }
 0x3c7   :  { %v1880_v36 = vpop.f32.mrf.mxu2 }
 0x3c8   :  { %v1739_v32 = vmax.f32 %v3898_v40, 0.0  ;;  %v1881_v61 = vadd.f32 %v3821_v8, %v1880_v36 }
 0x3c9   :  { %v1609_v10 = vpop.f32.mrf.mxu1 }
 0x3ca   :  { %v1944_v22 = vmax.f32 %v1881_v61, 0.0  ;;  %v1765_v56 = vpack.c.bf16 %v1739_v32, %v1738_v15  ;;  %v1610_v16 = vadd.f32 %v3693_v28, %v1609_v10 }
 0x3cc   :  { %v1979_v23 = vpack.c.bf16 %v1944_v22, %v1943_v39  ;;  %2683 = vmatmul.msk.bf16.gmra.mxu2 %vm438_vm3, %v1765_v56  ;;  %v1644_v38 = vadd.f32 %v1610_v16, %v3667_v49 }
 0x3ce   :  { %2707 = vmatmul.msk.bf16.gmra.mxu3 %vm438_vm3, %v1979_v23  ;;  %v3908_v11 = vadd.f32 %v1676_v45, %v1644_v38 }
 0x3cf   :  { %v1883_v3 = vpop.f32.mrf.mxu2 }
 0x3d0   :  { %v1884_v7 = vadd.f32 %v3821_v8, %v1883_v3  ;;  %v1740_v53 = vmax.f32 %v3908_v11, 0.0 }
 0x3d1   :  { %v1611_v37 = vpop.f32.mrf.mxu1 }
 0x3d2   :  { %v1612_v20 = vadd.f32 %v3693_v28, %v1611_v37  ;;  %v1945_v51 = vmax.f32 %v1884_v7, 0.0 }
 0x3d4   :  { %v1645_v54 = vadd.f32 %v1612_v20, %v3670_v50 }
 0x3d6   :  { %v3912_v35 = vadd.f32 %v1677_v13, %v1645_v54 }
 0x3d7   :  { %v1885_v9 = vpop.f32.mrf.mxu2 }
 0x3d8   :  { %v1741_v48 = vmax.f32 %v3912_v35, 0.0  ;;  %v1886_v49 = vadd.f32 %v3821_v8, %v1885_v9 }
 0x3da   :  { %v1946_v60 = vmax.f32 %v1886_v49, 0.0  ;;  %v1766_v28 = vpack.c.bf16 %v1741_v48, %v1740_v53 }
 0x3dc   :  { %v1980_v19 = vpack.c.bf16 %v1946_v60, %v1945_v51  ;;  %2684 = vmatmul.msk.bf16.gmra.mxu2 %vm438_vm3, %v1766_v28 }
 0x3de   :  { %2708 = vmatmul.msk.bf16.gmra.mxu3 %vm438_vm3, %v1980_v19 }
 0x3df   :  { %v1888_v50 = vpop.f32.mrf.mxu2 }
 0x3e0   :  { %v1889_v41 = vadd.f32 %v3821_v8, %v1888_v50 }
 0x3e2   :  { %v1947_v0 = vmax.f32 %v1889_v41, 0.0 }
 0x3e7   :  { %v1890_v59 = vpop.f32.mrf.mxu2 }
 0x3e8   :  { %v1891_v42 = vadd.f32 %v3821_v8, %v1890_v59 }
 0x3ea   :  { %v1948_v36 = vmax.f32 %v1891_v42, 0.0 }
 0x3ec   :  { %v1981_v15 = vpack.c.bf16 %v1948_v36, %v1947_v0 }
 0x3ee   :  { %2709 = vmatmul.msk.bf16.gmra.mxu3 %vm438_vm3, %v1981_v15 }
 0x3ef   :  { %v1893_v32 = vpop.f32.mrf.mxu2 }
 0x3f0   :  { %v1894_v61 = vadd.f32 %v3821_v8, %v1893_v32 }
 0x3f2   :  { %v1949_v22 = vmax.f32 %v1894_v61, 0.0 }
 0x3f7   :  { %v1895_v10 = vpop.f32.mrf.mxu2 }
 0x3f8   :  { %v1896_v39 = vadd.f32 %v3821_v8, %v1895_v10 }
 0x3fa   :  { %v1950_v56 = vmax.f32 %v1896_v39, 0.0 }
 0x3fc   :  { %v1982_v23 = vpack.c.bf16 %v1950_v56, %v1949_v22 }
 0x3fe   :  { %2710 = vmatmul.msk.bf16.gmra.mxu3 %vm438_vm3, %v1982_v23 }
 0x3ff   :  { %v1898_v16 = vpop.f32.mrf.mxu2 }
 0x400   :  { %v1899_v38 = vadd.f32 %v3821_v8, %v1898_v16 }
 0x401   :  { %v3925_v3 = vpop.f32.mrf.mxu3 }
 0x402   :  { %v1951_v54 = vmax.f32 %v1899_v38, 0.0 }
 0x407   :  { %v1900_v37 = vpop.f32.mrf.mxu2 }
 0x408   :  { %v1901_v20 = vadd.f32 %v3821_v8, %v1900_v37 }
 0x409   :  { %v3929_v45 = vpop.f32.mrf.mxu3 }
 0x40a   :  { %v1952_v13 = vmax.f32 %v1901_v20, 0.0 }
 0x40c   :  { %v1983_v7 = vpack.c.bf16 %v1952_v13, %v1951_v54 }
 0x40e   :  { %2711 = vmatmul.msk.bf16.gmra.mxu3 %vm438_vm3, %v1983_v7 }
 0x40f   :  { %v1903_v9 = vpop.f32.mrf.mxu2 }
 0x410   :  { %v1904_v48 = vadd.f32 %v3821_v8, %v1903_v9 }
 0x411   :  { %v3932_v53 = vpop.f32.mrf.mxu3 }
 0x412   :  { %v1953_v28 = vmax.f32 %v1904_v48, 0.0 }
 0x417   :  { %v1905_v49 = vpop.f32.mrf.mxu2 }
 0x418   :  { %v1906_v51 = vadd.f32 %v3821_v8, %v1905_v49 }
 0x419   :  { %v3936_v60 = vpop.f32.mrf.mxu3 }
 0x41a   :  { %v1954_v19 = vmax.f32 %v1906_v51, 0.0 }
 0x41c   :  { %v1984_v50 = vpack.c.bf16 %v1954_v19, %v1953_v28 }
 0x41e   :  { %2712 = vmatmul.msk.bf16.gmra.mxu3 %vm438_vm3, %v1984_v50 }
 0x41f   :  { %v1908_v41 = vpop.f32.mrf.mxu2 }
 0x420   :  { %v1909_v42 = vadd.f32 %v3821_v8, %v1908_v41 }
 0x421   :  { %v3939_v59 = vpop.f32.mrf.mxu3 }
 0x422   :  { %v1955_v32 = vmax.f32 %v1909_v42, 0.0 }
 0x427   :  { %v1910_v0 = vpop.f32.mrf.mxu2 }
 0x428   :  { %v1911_v36 = vadd.f32 %v3821_v8, %v1910_v0 }
 0x429   :  { %v3943_v15 = vpop.f32.mrf.mxu3 }
 0x42a   :  { %v1956_v61 = vmax.f32 %v1911_v36, 0.0 }
 0x42c   :  { %v1985_v10 = vpack.c.bf16 %v1956_v61, %v1955_v32 }
 0x42e   :  { %2713 = vmatmul.msk.bf16.gmra.mxu3 %vm438_vm3, %v1985_v10 }
 0x42f   :  { %v1913_v39 = vpop.f32.mrf.mxu2 }
 0x430   :  { %v1914_v56 = vadd.f32 %v3821_v8, %v1913_v39 }
 0x431   :  { %v3946_v22 = vpop.f32.mrf.mxu3 }
 0x432   :  { %v1957_v37 = vmax.f32 %v1914_v56, 0.0 }
 0x437   :  { %v1915_v23 = vpop.f32.mrf.mxu2 }
 0x438   :  { %v1916_v16 = vadd.f32 %v3821_v8, %v1915_v23 }
 0x439   :  { %v3950_v38 = vpop.f32.mrf.mxu3 }
 0x43a   :  { %v1958_v20 = vmax.f32 %v1916_v16, 0.0 }
 0x43c   :  { %v1986_v54 = vpack.c.bf16 %v1958_v20, %v1957_v37 }
 0x43e   :  { %2714 = vmatmul.msk.bf16.gmra.mxu3 %vm438_vm3, %v1986_v54 }
 0x43f   :  { %v1918_v13 = vpop.f32.mrf.mxu2 }
 0x440   :  { %v1919_v9 = vadd.f32 %v3821_v8, %v1918_v13 }
 0x441   :  { %v2096_v7 = vpop.f32.mrf.mxu3 }
 0x442   :  { %v1959_v28 = vmax.f32 %v1919_v9, 0.0 }
 0x447   :  { %v1920_v48 = vpop.f32.mrf.mxu2 }
 0x448   :  { %v1921_v49 = vadd.f32 %v3821_v8, %v1920_v48 }
 0x449   :  { %v2098_v51 = vpop.f32.mrf.mxu3 }
 0x44a   :  { %v1960_v19 = vmax.f32 %v1921_v49, 0.0 }
 0x44c   :  { %v1987_v50 = vpack.c.bf16 %v1960_v19, %v1959_v28  ;;  %v3965_v19 = vld [vmem:[%s4104_s6 + $0x2] ss:$0 sm:$0xff] }
 0x44e   :  { %2715 = vmatmul.msk.bf16.gmra.mxu3 %vm438_vm3, %v1987_v50 }
 0x44f   :  { %v1923_v41 = vpop.f32.mrf.mxu2 }
 0x450   :  { %v1924_v0 = vadd.f32 %v3821_v8, %v1923_v41 }
 0x451   :  { %v2101_v42 = vpop.f32.mrf.mxu3 }
 0x452   :  { %v1961_v10 = vmax.f32 %v1924_v0, 0.0 }
 0x457   :  { %v1925_v36 = vpop.f32.mrf.mxu2 }
 0x458   :  { %v1926_v32 = vadd.f32 %v3821_v8, %v1925_v36 }
 0x459   :  { %v2103_v61 = vpop.f32.mrf.mxu3 }
 0x45a   :  { %v1962_v39 = vmax.f32 %v1926_v32, 0.0 }
 0x45c   :  { %v1988_v56 = vpack.c.bf16 %v1962_v39, %v1961_v10 }
 0x45e   :  { %2716 = vmatmul.msk.bf16.gmra.mxu3 %vm438_vm3, %v1988_v56 }
 0x45f   :  { %v1928_v23 = vpop.f32.mrf.mxu2 }
 0x460   :  { %v1929_v37 = vadd.f32 %v3821_v8, %v1928_v23 }
 0x461   :  { %v2106_v16 = vpop.f32.mrf.mxu3 }
 0x462   :  { %v1963_v9 = vmax.f32 %v1929_v37, 0.0  ;;  %v2107_v56 = vadd.f32 %v3965_v19, %v2106_v16 }
 0x467   :  { %v1930_v20 = vpop.f32.mrf.mxu2 }
 0x468   :  { %v1931_v54 = vadd.f32 %v3821_v8, %v1930_v20  ;;  %v2104_v20 = vadd.f32 %v3965_v19, %v2103_v61  ;;  %v2097_v61 = vadd.f32 %v3965_v19, %v2096_v7 }
 0x469   :  { %v2108_v13 = vpop.f32.mrf.mxu3 }
 0x46a   :  { %v1964_v48 = vmax.f32 %v1931_v54, 0.0  ;;  %v2109_v8 = vadd.f32 %v3965_v19, %v2108_v13  ;;  %v2102_v13 = vadd.f32 %v3965_v19, %v2101_v42  ;;  %v2164_v42 = vadd.f32 %v2097_v61, %v3755_v55 }
 0x46c   :  { %v1989_v49 = vpack.c.bf16 %v1964_v48, %v1963_v9  ;;  %v2169_v23 = vadd.f32 %v2109_v8, %v3787_v29  ;;  %v2167_v9 = vadd.f32 %v2104_v20, %v3773_v46  ;;  %v2099_v29 = vadd.f32 %v3965_v19, %v2098_v51 }
 0x46d   :  { %v2166_v16 = vadd.f32 %v2102_v13, %v3769_v17  ;;  %v2094_v46 = vadd.f32 %v3965_v19, %v3950_v38  ;;  %v2087_v8 = vadd.f32 %v3965_v19, %v3939_v59  ;;  %v2077_v20 = vadd.f32 %v3965_v19, %v3925_v3 }
 0x46e   :  { %2717 = vmatmul.msk.bf16.gmra.mxu3 %vm438_vm3, %v1989_v49  ;;  %v2201_v54 = vmax.f32 %v2169_v23, 0.0  ;;  %v2199_v49 = vmax.f32 %v2167_v9, 0.0 }
 0x46f   :  { %v2163_v7 = vadd.f32 %v2094_v46, %v3745_v21  ;;  %v2084_v21 = vadd.f32 %v3965_v19, %v3936_v60 }
 0x471   :  { %v2111_v28 = vpop.f32.mrf.mxu3  ;;  %v2159_v59 = vadd.f32 %v2084_v21, %v3717_v4  ;;  %v2156_v4 = vadd.f32 %v2077_v20, %v3699_v33 }
 0x472   :  { %v2112_v41 = vadd.f32 %v3965_v19, %v2111_v28  ;;  %v2165_v28 = vadd.f32 %v2099_v29, %v3759_v24  ;;  %v2089_v24 = vadd.f32 %v3965_v19, %v3943_v15  ;;  %v2160_v15 = vadd.f32 %v2087_v8, %v3727_v63 }
 0x473   :  { %v2188_v13 = vmax.f32 %v2156_v4, 0.0 }
 0x474   :  { %v2170_v32 = vadd.f32 %v2112_v41, %v3797_v52  ;;  %v2197_v51 = vmax.f32 %v2165_v28, 0.0  ;;  %v2092_v41 = vadd.f32 %v3965_v19, %v3946_v22  ;;  %v2161_v22 = vadd.f32 %v2089_v24, %v3731_v30 }
 0x475   :  { %v2192_v23 = vmax.f32 %v2160_v15, 0.0  ;;  %v2079_v30 = vadd.f32 %v3965_v19, %v3929_v45 }
 0x476   :  { %v2202_v37 = vmax.f32 %v2170_v32, 0.0  ;;  %v2162_v38 = vadd.f32 %v2092_v41, %v3741_v57 }
 0x478   :  { %v2194_v32 = vmax.f32 %v2162_v38, 0.0 }
 0x479   :  { %v2113_v50 = vpop.f32.mrf.mxu3 }
 0x47a   :  { %v2114_v0 = vadd.f32 %v3965_v19, %v2113_v50  ;;  %v2198_v50 = vmax.f32 %v2166_v16, 0.0 }
 0x47c   :  { %v2171_v36 = vadd.f32 %v2114_v0, %v3800_v12  ;;  %v2168_v12 = vadd.f32 %v2107_v56, %v3783_v18  ;;  %v2196_v0 = vmax.f32 %v2164_v42, 0.0  ;;  %v2082_v56 = vadd.f32 %v3965_v19, %v3932_v53 }
 0x47e   :  { %v2203_v10 = vmax.f32 %v2171_v36, 0.0  ;;  %v2200_v48 = vmax.f32 %v2168_v12, 0.0  ;;  %v2195_v36 = vmax.f32 %v2163_v7, 0.0  ;;  %v2158_v60 = vadd.f32 %v2082_v56, %v3713_v2 }
 0x47f   :  { %v2157_v12 = vadd.f32 %v2079_v30, %v3703_v26 }
 0x480   :  { %2718 = vmatpush.xpose.msk.msra.mxu0 %vm438_vm3, %v2203_v10  ;;  %v2193_v10 = vmax.f32 %v2161_v22, 0.0  ;;  %v2190_v53 = vmax.f32 %v2158_v60, 0.0  ;;  %v2221_v60 = vld [vmem:[#allocation3] sm:$0x1] }
 0x481   :  { %v3973_v39 = vpop.f32.mrf.mxu3 }
 0x484   :  { %2719 = vmatpush.xpose.msk.msra.mxu0 %vm438_vm3, %v2202_v37  ;;  %v2191_v37 = vmax.f32 %v2159_v59, 0.0 }
 0x488   :  { %2720 = vmatpush.xpose.msk.msra.mxu0 %vm438_vm3, %v2201_v54  ;;  %v2189_v54 = vmax.f32 %v2157_v12, 0.0 }
 0x489   :  { %v3981_v52 = vpop.f32.mrf.mxu3 }
 0x48c   :  { %2721 = vmatpush.xpose.msk.msra.mxu0 %vm438_vm3, %v2200_v48 }
 0x490   :  { %2722 = vmatpush.xpose.msk.msra.mxu0 %vm438_vm3, %v2199_v49 }
 0x491   :  { %v3989_v18 = vpop.f32.mrf.mxu3 }
 0x494   :  { %2723 = vmatpush.xpose.msk.msra.mxu0 %vm438_vm3, %v2198_v50 }
 0x498   :  { %2724 = vmatpush.xpose.msk.msra.mxu0 %vm438_vm3, %v2197_v51 }
 0x499   :  { %v3998_v17 = vpop.f32.mrf.mxu3 }
 0x49c   :  { %2725 = vmatpush.xpose.msk.msra.mxu0 %vm438_vm3, %v2196_v0 }
 0x4a0   :  { %2726 = vmatpush.xpose.msk.msra.mxu0 %vm438_vm3, %v2195_v36 }
 0x4a1   :  { %v4008_v55 = vpop.f32.mrf.mxu3 }
 0x4a4   :  { %2727 = vmatpush.xpose.msk.msra.mxu0 %vm438_vm3, %v2194_v32 }
 0x4a8   :  { %2728 = vmatpush.xpose.msk.msra.mxu0 %vm438_vm3, %v2193_v10 }
 0x4a9   :  { %v4018_v57 = vpop.f32.mrf.mxu3 }
 0x4ac   :  { %2729 = vmatpush.xpose.msk.msra.mxu0 %vm438_vm3, %v2192_v23  ;;  %v2129_v23 = vadd.f32 %v3965_v19, %v4018_v57  ;;  %v2124_v57 = vadd.f32 %v3965_v19, %v3998_v17 }
 0x4ae   :  { %v2175_v4 = vadd.f32 %v2124_v57, %v3828_v14 }
 0x4b0   :  { %2730 = vmatpush.xpose.msk.msra.mxu0 %vm438_vm3, %v2191_v37  ;;  %v2866_v37 = vmov 0  }
 0x4b1   :  { %v2131_v63 = vpop.f32.mrf.mxu3  ;;  %2802 = vset.pattern.permute.xlu2 %v2866_v37  ;;  %2803 = vset.pattern.permute.xlu0 %v2866_v37 }
 0x4b2   :  { %v2132_v56 = vadd.f32 %v3965_v19, %v2131_v63  ;;  %2224 = vperm.xlu2 %2802, %v2221_v60   ;;  %v2177_v63 = vadd.f32 %v2129_v23, %v3842_v62  ;;  %v2119_v62 = vadd.f32 %v3965_v19, %v3981_v52 }
 0x4b4   :  { %2731 = vmatpush.xpose.msk.msra.mxu0 %vm438_vm3, %v2190_v53  ;;  %v2209_v12 = vmax.f32 %v2177_v63, 0.0  ;;  %v2122_v53 = vadd.f32 %v3965_v19, %v3989_v18  ;;  %v2173_v17 = vadd.f32 %v2119_v62, %v3811_v25 }
 0x4b6   :  { %v2205_v18 = vmax.f32 %v2173_v17, 0.0 }
 0x4b8   :  { %2732 = vmatpush.xpose.msk.msra.mxu0 %vm438_vm3, %v2189_v54 }
 0x4b9   :  { %v2133_v45 = vpop.f32.mrf.mxu3 }
 0x4ba   :  { %v2134_v15 = vadd.f32 %v3965_v19, %v2133_v45  ;;  %v2207_v45 = vmax.f32 %v2175_v4, 0.0 }
 0x4bc   :  { %2733 = vmatpush.xpose.msk.msra.mxu0 %vm438_vm3, %v2188_v13 }
 0x4c1   :  { %v2136_v2 = vpop.f32.mrf.mxu3 }
 0x4c2   :  { %v2137_v32 = vadd.f32 %v3965_v19, %v2136_v2 }
 0x4c9   :  { %v2138_v9 = vpop.f32.mrf.mxu3 }
 0x4ca   :  { %v2139_v8 = vadd.f32 %v3965_v19, %v2138_v9  ;;  %v2372_v9 = vlaneseq }
 0x4cc   :  { %vm2374_vm4 = vcmp.lt.s32.totalorder %v2372_v9, 256 }
 0x4d1   :  { %v2141_v48 = vpop.f32.mrf.mxu3 }
 0x4d9   :  { %v2143_v29 = vpop.f32.mrf.mxu3 }
 0x4da   :  { %v2144_v0 = vadd.f32 %v3965_v19, %v2143_v29 }
 0x4e1   :  { %v2146_v16 = vpop.f32.mrf.mxu3 }
 0x4e2   :  { %v2147_v51 = vadd.f32 %v3965_v19, %v2146_v16 }
 0x4e4   :  { %v2184_v24 = vadd.f32 %v2147_v51, %v3894_v5  ;;  %v2181_v5 = vadd.f32 %v2139_v8, %v3870_v58  ;;  %v2220_v58 = vld [vmem:[%s4105_s7] sm:$0x1]  ;;  %s2867_s7 = smov [#allocation7]  }
 0x4e5   :  { %2734 = vmatmul.msk.f32.vlgmr.msra.gmra.mxu0 %vm438_vm3, %v2220_v58  ;;  %s2382_s10 = sshll.u32 %s2867_s7, 4  ;;  %s2383_s10 = int_to_ptr.vmem [resolvable:$true] %s2382_s10 }
 0x4e6   :  { %v2216_v36 = vmax.f32 %v2184_v24, 0.0  ;;  %v2213_v10 = vmax.f32 %v2181_v5, 0.0 }
 0x4e9   :  { %v2148_v3 = vpop.f32.mrf.mxu3 }
 0x4ea   :  { %v2149_v50 = vadd.f32 %v3965_v19, %v2148_v3 }
 0x4ec   :  { %v2185_v41 = vadd.f32 %v2149_v50, %v3898_v40 }
 0x4ee   :  { %v2217_v38 = vmax.f32 %v2185_v41, 0.0 }
 0x4f1   :  { %v2151_v49 = vpop.f32.mrf.mxu3 }
 0x4f2   :  { %v2152_v61 = vadd.f32 %v3965_v19, %v2151_v49 }
 0x4f4   :  { %v2186_v46 = vadd.f32 %v2152_v61, %v3908_v11  ;;  %v2183_v11 = vadd.f32 %v2144_v0, %v3884_v43  ;;  %v2180_v43 = vadd.f32 %v2137_v32, %v3866_v6  ;;  %v2178_v6 = vadd.f32 %v2132_v56, %v3852_v44 }
 0x4f6   :  { %v2218_v7 = vmax.f32 %v2186_v46, 0.0  ;;  %v2215_v22 = vmax.f32 %v2183_v11, 0.0  ;;  %v2212_v59 = vmax.f32 %v2180_v43, 0.0  ;;  %v2210_v20 = vmax.f32 %v2178_v6, 0.0 }
 0x4f9   :  { %v2153_v26 = vpop.f32.mrf.mxu3 }
 0x4fa   :  { %v2154_v28 = vadd.f32 %v3965_v19, %v2153_v26 }
 0x4fc   :  { %v2187_v33 = vadd.f32 %v2154_v28, %v3912_v35  ;;  %v2142_v35 = vadd.f32 %v3965_v19, %v2141_v48 }
 0x4fe   :  { %v2219_v42 = vmax.f32 %v2187_v33, 0.0  ;;  %v2182_v40 = vadd.f32 %v2142_v35, %v3880_v34  ;;  %v2179_v34 = vadd.f32 %v2134_v15, %v3856_v47  ;;  %v2127_v47 = vadd.f32 %v3965_v19, %v4008_v55 }
 0x4ff   :  { %v2174_v55 = vadd.f32 %v2122_v53, %v3824_v27 }
 0x500   :  { %2735 = vmatpush.xpose.msk.msra.mxu1 %vm438_vm3, %v2219_v42  ;;  %v2214_v21 = vmax.f32 %v2182_v40, 0.0  ;;  %v2211_v30 = vmax.f32 %v2179_v34, 0.0  ;;  %v2176_v44 = vadd.f32 %v2127_v47, %v3838_v1  ;;  %v2117_v1 = vadd.f32 %v3965_v19, %v3973_v39 }
 0x501   :  { %v2206_v13 = vmax.f32 %v2174_v55, 0.0 }
 0x502   :  { %v2208_v54 = vmax.f32 %v2176_v44, 0.0  ;;  %v2172_v14 = vadd.f32 %v2117_v1, %v3808_v31 }
 0x504   :  { %2736 = vmatpush.xpose.msk.msra.mxu1 %vm438_vm3, %v2218_v7  ;;  %v2204_v2 = vmax.f32 %v2172_v14, 0.0 }
 0x508   :  { %2737 = vmatpush.xpose.msk.msra.mxu1 %vm438_vm3, %v2217_v38 }
 0x50c   :  { %2738 = vmatpush.xpose.msk.msra.mxu1 %vm438_vm3, %v2216_v36  ;;  %v2225_v27 = vpop.permute.xlu2 %2224 }
 0x50d   :  { %v2227_v52 = vperm.slane %v2225_v27, 0 }
 0x510   :  { %2739 = vmatpush.xpose.msk.msra.mxu1 %vm438_vm3, %v2215_v22 }
 0x514   :  { %2740 = vmatpush.xpose.msk.msra.mxu1 %vm438_vm3, %v2214_v21 }
 0x518   :  { %2741 = vmatpush.xpose.msk.msra.mxu1 %vm438_vm3, %v2213_v10 }
 0x51c   :  { %2742 = vmatpush.xpose.msk.msra.mxu1 %vm438_vm3, %v2212_v59 }
 0x520   :  { %2743 = vmatpush.xpose.msk.msra.mxu1 %vm438_vm3, %v2211_v30 }
 0x524   :  { %2744 = vmatpush.xpose.msk.msra.mxu1 %vm438_vm3, %v2210_v20 }
 0x528   :  { %2745 = vmatpush.xpose.msk.msra.mxu1 %vm438_vm3, %v2209_v12 }
 0x52c   :  { %2746 = vmatpush.xpose.msk.msra.mxu1 %vm438_vm3, %v2208_v54 }
 0x530   :  { %2747 = vmatpush.xpose.msk.msra.mxu1 %vm438_vm3, %v2207_v45 }
 0x534   :  { %2748 = vmatpush.xpose.msk.msra.mxu1 %vm438_vm3, %v2206_v13 }
 0x538   :  { %2749 = vmatpush.xpose.msk.msra.mxu1 %vm438_vm3, %v2205_v18 }
 0x53c   :  { %2750 = vmatpush.xpose.msk.msra.mxu1 %vm438_vm3, %v2204_v2 }
 0x53f   :  { %2751 = vmatmul.msk.f32.vlgmr.msra.gmra.mxu1 %vm438_vm3, %v2220_v58 }
 0x562   :  { %v2344_v19 = vpop.f32.mrf.mxu0 }
 0x563   :  { %v2345_v25 = vadd.f32 %v2344_v19, %v2227_v52 }
 0x5bc   :  { %v2364_v48 = vpop.f32.mrf.mxu1 }
 0x5bd   :  { %v2365_v39 = vadd.f32 %v2364_v48, %v2227_v52 }
 0x5bf   :  { %v2369_v31 = vrot.slane %v2365_v39, 7 }
 0x5c1   :  { %v2370_v29 = vsel %vm249_vm0, %v2345_v25, %v2369_v31 }
 0x5c2   :  { %2376 = vst.msk [vmem:[#allocation7] sm:$0x3] %vm2374_vm4, %v2370_v29 }
 0x5c3   :  { %2387 = dma.vmem_to_hbm [thread:$0]  %s2383_s10, 32, %s2385_s11, [#allocation6]  }
 0x5c4   :  { %2860 = dma.done.wait [#allocation6], 32  }
 0x5c5   :  { %2861 = vsyncadd [#allocation6], 4294967264 }
 0x5c6   :  { %2392 = vsyncpa [#allocation5], 1 }
 0x5c7   :  { %2393 = vsyncpa [#allocation6], 1 }

</bundles_post_ra>
